<compile_context>
chip_gen: v5e
topology: v5e:2x2
jax: 0.10.0
libtpu: 0.0.40
codegen_flags: <defaults>
</compile_context>

<pallas_src>
import math

import jax
import jax.numpy as jnp
from jax.experimental import pallas as pl
from jax.experimental.pallas import tpu as pltpu

_BLOCK_B = 8     # batch rows per grid step (sublane/MXU row fill for the GRU)
_LANE = 128      # lane width: align/memory text axis padded to a multiple


def _attention_rnn_kernel(len_ref,        # (B_blk, 1)      int32
                          x_ref,          # (B_blk, T, D)   bf16
                          mem_ref,        # (B_blk, L, H)   bf16  (L lane-padded)
                          w_ih_t_ref,     # (D, 3H)         bf16
                          w_hh_t_ref,     # (H, 3H)         bf16  (fused r,z,n)
                          b_ih_ref,       # (1, 3H)         f32
                          b_hh_ref,       # (1, 3H)         f32
                          w_attn_t_ref,   # (H, H)          bf16
                          out_ref,        # (B_blk, T, 2H)  f32   [ctx | gru]
                          align_ref,      # (B_blk, T, L)   f32
                          hid_ref,        # (B_blk, H)      f32
                          gi_tm,          # VMEM (T, B_blk, 3H) f32 scratch
                          hs_tm):         # VMEM (T, B_blk, H)  f32 scratch
    Bb, T, D = x_ref.shape
    H = hid_ref.shape[1]
    L = align_ref.shape[2]

    # ---- Input projection hoisted out of the recurrence (one big MXU pass) ----
    x = x_ref[...].reshape(Bb * T, D)                                   # bf16
    gi = jnp.dot(x, w_ih_t_ref[...],
                 preferred_element_type=jnp.float32) + b_ih_ref[...]    # (Bb*T, 3H) f32
    # One-time relayout to time-major: the serial loop below only touches
    # contiguous (Bb, 3H) tiles via gi_tm[t] (no per-step strided slicing).
    gi_tm[...] = pltpu.einshape("btg->tbg", gi.reshape(Bb, T, 3 * H))

    w_hh_t = w_hh_t_ref[...]                                            # (H, 3H) bf16
    b_hh = b_hh_ref[...]                                                # (1, 3H) f32

    # ---- GRU recurrence (PyTorch gate order r, z, n); f32 carry & gate math ----
    def gru_step(t, h):                                                 # h: (Bb, H) f32
        gi_t = gi_tm[t]                                                 # (Bb, 3H) f32
        gh = jnp.dot(h.astype(w_hh_t.dtype), w_hh_t,                    # ONE fused dot
                     preferred_element_type=jnp.float32) + b_hh         # (Bb, 3H) f32
        r = jax.nn.sigmoid(gi_t[:, 0:H] + gh[:, 0:H])
        z = jax.nn.sigmoid(gi_t[:, H:2 * H] + gh[:, H:2 * H])
        n = jnp.tanh(gi_t[:, 2 * H:3 * H] + r * gh[:, 2 * H:3 * H])
        h_new = (1.0 - z) * n + z * h
        hs_tm[t] = h_new                                                # contiguous store
        return h_new

    unroll = next(u for u in (8, 4, 2, 1) if T % u == 0)                # static
    h0 = jnp.zeros((Bb, H), jnp.float32)
    h_last = jax.lax.fori_loop(0, T, gru_step, h0, unroll=unroll)
    hid_ref[...] = h_last

    # ---- Masked Luong-"general" attention over the (padded) text axis ----
    hs = pltpu.einshape("tbh->bth", hs_tm[...])                         # (Bb, T, H) f32
    mem = mem_ref[...]                                                  # (Bb, L, H) bf16
    keys = jnp.dot(mem.reshape(Bb * L, H), w_attn_t_ref[...],
                   preferred_element_type=jnp.float32)                  # (Bb*L, H) f32
    keys = keys.reshape(Bb, L, H).astype(mem.dtype)                     # bf16
    # Batched (T,H)x(L,H)^T score matmul; same pattern as the flash kernels.
    scores = jnp.einsum('bth,blh->btl', hs.astype(mem.dtype), keys,
                        preferred_element_type=jnp.float32)             # (Bb, T, L) f32

    # Mask rebuilt in-kernel from per-row lengths (also covers the L padding).
    lens = len_ref[...][:, :, None]                                     # (Bb, 1, 1) i32
    col = jax.lax.broadcasted_iota(jnp.int32, (Bb, T, L), 2)
    scores = jnp.where(col < lens, scores, -1e30)

    m = jnp.max(scores, axis=-1, keepdims=True)
    e = jnp.exp(scores - m)
    s = jnp.sum(e, axis=-1, keepdims=True)
    align = e * pl.reciprocal(s, approx=False)                          # exact softmax

    ctx = jnp.einsum('btl,blh->bth', align.astype(mem.dtype), mem,
                     preferred_element_type=jnp.float32)                # (Bb, T, H) f32

    align_ref[...] = align
    out_ref[:, :, 0:H] = ctx                                            # fused output slab
    out_ref[:, :, H:2 * H] = hs


def _round_up(n, m):
    return ((n + m - 1) // m) * m


@jax.jit
def attention_rnn(x, memory, text_length, params):
    """x: (B,T,D) f32, memory: (B,L,H) f32, text_length: (B,) int32."""
    B, T, D = x.shape
    _, L, H = memory.shape
    cdt = jnp.bfloat16

    # Batch block: whole batch if small, otherwise 8 rows per grid step.
    B_blk = B if B <= _BLOCK_B else max(8, (_BLOCK_B // 8) * 8)
    B_pad = _round_up(B, B_blk)
    # Lane-dense align output / memory: pad the text axis to a multiple of 128.
    L_pad = _round_up(L, _LANE)

    x_p = x.astype(cdt)
    mem_p = memory.astype(cdt)
    tl_p = text_length.astype(jnp.int32)
    if B_pad != B:
        x_p = jnp.pad(x_p, ((0, B_pad - B), (0, 0), (0, 0)))
        mem_p = jnp.pad(mem_p, ((0, B_pad - B), (0, 0), (0, 0)))
        tl_p = jnp.pad(tl_p, (0, B_pad - B))
    if L_pad != L:
        mem_p = jnp.pad(mem_p, ((0, 0), (0, L_pad - L), (0, 0)))
    lens2d = tl_p.reshape(B_pad, 1)

    # bf16 MXU operands (transposed), f32 biases; recurrent gate order (r,z,n).
    w_ih_t = params['w_ih'].T.astype(cdt)                    # (D, 3H)
    w_hh_t = params['w_hh'].T.astype(cdt)                    # (H, 3H)
    b_ih = params['b_ih'].astype(jnp.float32)[None, :]       # (1, 3H)
    b_hh = params['b_hh'].astype(jnp.float32)[None, :]       # (1, 3H)
    w_attn_t = params['w_attn'].T.astype(cdt)                # (H, H)

    grid = (B_pad // B_blk,)
    grid_spec = pltpu.PrefetchScalarGridSpec(
        num_scalar_prefetch=0,
        grid=grid,
        in_specs=[
            pl.BlockSpec((B_blk, 1), lambda b: (b, 0)),              # lengths
            pl.BlockSpec((B_blk, T, D), lambda b: (b, 0, 0)),        # x
            pl.BlockSpec((B_blk, L_pad, H), lambda b: (b, 0, 0)),    # memory
            pl.BlockSpec((D, 3 * H), lambda b: (0, 0)),              # w_ih^T
            pl.BlockSpec((H, 3 * H), lambda b: (0, 0)),              # w_hh^T
            pl.BlockSpec((1, 3 * H), lambda b: (0, 0)),              # b_ih
            pl.BlockSpec((1, 3 * H), lambda b: (0, 0)),              # b_hh
            pl.BlockSpec((H, H), lambda b: (0, 0)),                  # w_attn^T
        ],
        out_specs=[
            pl.BlockSpec((B_blk, T, 2 * H), lambda b: (b, 0, 0)),    # [ctx | gru]
            pl.BlockSpec((B_blk, T, L_pad), lambda b: (b, 0, 0)),    # align
            pl.BlockSpec((B_blk, H), lambda b: (b, 0)),              # final hidden
        ],
        scratch_shapes=[
            pltpu.VMEM((T, B_blk, 3 * H), jnp.float32),   # hoisted input projection
            pltpu.VMEM((T, B_blk, H), jnp.float32),       # GRU outputs (time-major)
        ],
    )
    out_shapes = (
        jax.ShapeDtypeStruct((B_pad, T, 2 * H), jnp.float32),
        jax.ShapeDtypeStruct((B_pad, T, L_pad), jnp.float32),
        jax.ShapeDtypeStruct((B_pad, H), jnp.float32),
    )

    flops = 2 * B_pad * (T * D * 3 * H + T * 3 * H * H
                         + L_pad * H * H + 2 * T * L_pad * H)
    transcendentals = B_pad * T * (3 * H + L_pad)
    bytes_accessed = (x_p.size * 2 + mem_p.size * 2 + lens2d.size * 4
                      + (w_ih_t.size + w_hh_t.size + w_attn_t.size) * 2
                      + (b_ih.size + b_hh.size) * 4
                      + (B_pad * T * 2 * H + B_pad * T * L_pad + B_pad * H) * 4)

    fused, align, hid = pl.pallas_call(
        _attention_rnn_kernel,
        out_shape=out_shapes,
        grid_spec=grid_spec,
        compiler_params=pltpu.CompilerParams(
            dimension_semantics=("parallel",),
            vmem_limit_bytes=48 * 1024 * 1024,   # above 16/32 MiB defaults; v7x headroom
        ),
        cost_estimate=pl.CostEstimate(flops=flops,
                                      transcendentals=transcendentals,
                                      bytes_accessed=bytes_accessed),
    )(lens2d, x_p, mem_p, w_ih_t, w_hh_t, b_ih, b_hh, w_attn_t)

    out = fused[:B]                                   # (B, T, 2H) = [context, gru_out]
    align = align[:B, :, :L]                          # (B, T, L)
    hidden = hid[:B][None, :, :]                      # (1, B, H)
    return out, align, hidden


def _reference(x, memory, text_length, params):
    """Pure-JAX reference mirroring the kernel's mixed-precision scheme."""
    cdt, f32 = jnp.bfloat16, jnp.float32
    B, T, D = x.shape
    _, L, H = memory.shape
    w_ih_t = params['w_ih'].T.astype(cdt)
    w_hh_t = params['w_hh'].T.astype(cdt)
    b_ih = params['b_ih'].astype(f32)
    b_hh = params['b_hh'].astype(f32)
    w_attn_t = params['w_attn'].T.astype(cdt)
    xb, memb = x.astype(cdt), memory.astype(cdt)

    gi = jnp.einsum('btd,dg->btg', xb, w_ih_t, preferred_element_type=f32) + b_ih

    def step(h, gi_t):
        gh = jnp.dot(h.astype(cdt), w_hh_t, preferred_element_type=f32) + b_hh
        r = jax.nn.sigmoid(gi_t[:, :H] + gh[:, :H])
        z = jax.nn.sigmoid(gi_t[:, H:2 * H] + gh[:, H:2 * H])
        n = jnp.tanh(gi_t[:, 2 * H:] + r * gh[:, 2 * H:])
        h_new = (1.0 - z) * n + z * h
        return h_new, h_new

    h0 = jnp.zeros((B, H), f32)
    h_last, hs = jax.lax.scan(step, h0, jnp.swapaxes(gi, 0, 1))
    hs = jnp.swapaxes(hs, 0, 1)                                         # (B, T, H)

    keys = jnp.einsum('blh,hk->blk', memb, w_attn_t, preferred_element_type=f32)
    scores = jnp.einsum('bth,blh->btl', hs.astype(cdt), keys.astype(cdt),
                        preferred_element_type=f32)
    mask = jnp.arange(L)[None, None, :] < text_length[:, None, None]
    scores = jnp.where(mask, scores, -1e30)
    align = jax.nn.softmax(scores, axis=-1)
    ctx = jnp.einsum('btl,blh->bth', align.astype(cdt), memb,
                     preferred_element_type=f32)
    return jnp.concatenate([ctx, hs], axis=-1), align, h_last[None]


def init_params(key, dim_input, dim_hidden):
    """Deterministic PyTorch-style uniform(-1/sqrt(H), 1/sqrt(H)) init."""
    bound = 1.0 / math.sqrt(dim_hidden)
    k = jax.random.split(key, 5)
    u = lambda kk, shape: jax.random.uniform(kk, shape, jnp.float32, -bound, bound)
    return {
        'w_ih': u(k[0], (3 * dim_hidden, dim_input)),    # weight_ih_l0 (r,z,n)
        'w_hh': u(k[1], (3 * dim_hidden, dim_hidden)),   # weight_hh_l0 (r,z,n)
        'b_ih': u(k[2], (3 * dim_hidden,)),              # bias_ih_l0
        'b_hh': u(k[3], (3 * dim_hidden,)),              # bias_hh_l0
        'w_attn': u(k[4], (dim_hidden, dim_hidden)),     # attention key projection
    }


if __name__ == "__main__":
    B, T, D, H, L = 2, 8, 16, 32, 12   # batch, audio_len, dim_input, dim_hidden, text_len

    key = jax.random.PRNGKey(0)
    kx, km, kp = jax.random.split(key, 3)
    x = jax.random.normal(kx, (B, T, D), jnp.float32)
    memory = jax.random.normal(km, (B, L, H), jnp.float32)
    text_length = jnp.array([12, 7], dtype=jnp.int32)
    params = init_params(kp, D, H)

    out, align, hidden = attention_rnn(x, memory, text_length, params)
    jax.block_until_ready((out, align, hidden))

    assert out.shape == (B, T, 2 * H)
    assert align.shape == (B, T, L)
    assert hidden.shape == (1, B, H)
    assert bool(jnp.all(jnp.isfinite(out)))
    # attention weights sum to 1 over the text axis (exact softmax)
    assert bool(jnp.allclose(jnp.sum(align, axis=-1), 1.0, atol=1e-3))
    # masked text positions (batch 1 has text_length=7) must get ~zero weight
    assert float(jnp.max(align[1, :, 7:])) < 1e-6

    ref_out, ref_align, ref_hidden = _reference(x, memory, text_length, params)
    assert bool(jnp.allclose(out, ref_out, atol=2e-2, rtol=2e-2))
    assert bool(jnp.allclose(align, ref_align, atol=2e-2, rtol=2e-2))
    assert bool(jnp.allclose(hidden, ref_hidden, atol=2e-2, rtol=2e-2))

    print("KERNEL_OK")
</pallas_src>

<mosaic_0001>
module attributes {stable_mosaic.version = 11 : i64} {
  func.func @_attention_rnn_kernel(%arg0: i32, %arg1: memref<2x1xi32, #tpu.memory_space<vmem>>, %arg2: memref<2x8x16xbf16, #tpu.memory_space<vmem>>, %arg3: memref<2x128x32xbf16, #tpu.memory_space<vmem>>, %arg4: memref<16x96xbf16, #tpu.memory_space<vmem>>, %arg5: memref<32x96xbf16, #tpu.memory_space<vmem>>, %arg6: memref<1x96xf32, #tpu.memory_space<vmem>>, %arg7: memref<1x96xf32, #tpu.memory_space<vmem>>, %arg8: memref<32x32xbf16, #tpu.memory_space<vmem>>, %arg9: memref<2x8x64xf32, #tpu.memory_space<vmem>>, %arg10: memref<2x8x128xf32, #tpu.memory_space<vmem>>, %arg11: memref<2x32xf32, #tpu.memory_space<vmem>>, %arg12: memref<8x2x96xf32, #tpu.memory_space<vmem>>, %arg13: memref<8x2x32xf32, #tpu.memory_space<vmem>>) attributes {dimension_semantics = [#tpu.dimension_semantics<parallel>], iteration_bounds = array<i64: 1>, scalar_prefetch = 0 : i64, scratch_operands = 2 : i64, tpu.core_type = #tpu.core_type<tc>, window_params = [{transform_indices = @transform_0, window_bounds = array<i64: 2, 1>}, {transform_indices = @transform_1, window_bounds = array<i64: 2, 8, 16>}, {transform_indices = @transform_2, window_bounds = array<i64: 2, 128, 32>}, {pipeline_mode = #tpu.pipeline_mode<synchronous>, transform_indices = @transform_3, window_bounds = array<i64: 16, 96>}, {pipeline_mode = #tpu.pipeline_mode<synchronous>, transform_indices = @transform_4, window_bounds = array<i64: 32, 96>}, {pipeline_mode = #tpu.pipeline_mode<synchronous>, transform_indices = @transform_5, window_bounds = array<i64: 1, 96>}, {pipeline_mode = #tpu.pipeline_mode<synchronous>, transform_indices = @transform_6, window_bounds = array<i64: 1, 96>}, {pipeline_mode = #tpu.pipeline_mode<synchronous>, transform_indices = @transform_7, window_bounds = array<i64: 32, 32>}, {transform_indices = @transform_8, window_bounds = array<i64: 2, 8, 64>}, {transform_indices = @transform_9, window_bounds = array<i64: 2, 8, 128>}, {transform_indices = @transform_10, window_bounds = array<i64: 2, 32>}]} {
    %c0 = arith.constant 0 : index
    %c0_0 = arith.constant 0 : index
    %c0_1 = arith.constant 0 : index
    %0 = vector.load %arg2[%c0, %c0_0, %c0_1] : memref<2x8x16xbf16, #tpu.memory_space<vmem>>, vector<2x8x16xbf16>
    %1 = vector.shape_cast %0 : vector<2x8x16xbf16> to vector<16x16xbf16>
    %c0_2 = arith.constant 0 : index
    %c0_3 = arith.constant 0 : index
    %2 = vector.load %arg4[%c0_2, %c0_3] : memref<16x96xbf16, #tpu.memory_space<vmem>>, vector<16x96xbf16>
    %cst = arith.constant dense<0.000000e+00> : vector<16x96xf32>
    %3 = tpu.matmul %1, %2, %cst {dimension_numbers = #tpu.dot_dimension_numbers<[1], [0], [0], [1], [0, 0, 1, 1], [], []>} : vector<16x16xbf16>, vector<16x96xbf16>, vector<16x96xf32> -> vector<16x96xf32>
    %c0_4 = arith.constant 0 : index
    %c0_5 = arith.constant 0 : index
    %4 = vector.load %arg6[%c0_4, %c0_5] : memref<1x96xf32, #tpu.memory_space<vmem>>, vector<1x96xf32>
    %5 = vector.broadcast %4 : vector<1x96xf32> to vector<16x96xf32>
    %6 = arith.addf %3, %5 : vector<16x96xf32>
    %7 = vector.shape_cast %6 : vector<16x96xf32> to vector<2x8x96xf32>
    %8 = tpu.transpose %7, [1, 0, 2] : vector<2x8x96xf32> -> vector<8x2x96xf32>
    %c0_6 = arith.constant 0 : index
    %c0_7 = arith.constant 0 : index
    %c0_8 = arith.constant 0 : index
    %9 = vector.load %arg12[%c0_6, %c0_7, %c0_8] : memref<8x2x96xf32, #tpu.memory_space<vmem>>, vector<8x2x96xf32>
    tpu.vector_store %arg12[%c0_6, %c0_7, %c0_8], %8 {strides = array<i32>} : memref<8x2x96xf32, #tpu.memory_space<vmem>>, vector<8x2x96xf32>,
    %c0_9 = arith.constant 0 : index
    %c0_10 = arith.constant 0 : index
    %10 = vector.load %arg5[%c0_9, %c0_10] : memref<32x96xbf16, #tpu.memory_space<vmem>>, vector<32x96xbf16>
    %c0_11 = arith.constant 0 : index
    %c0_12 = arith.constant 0 : index
    %11 = vector.load %arg7[%c0_11, %c0_12] : memref<1x96xf32, #tpu.memory_space<vmem>>, vector<1x96xf32>
    %cst_13 = arith.constant 0.000000e+00 : f32
    %12 = vector.broadcast %cst_13 : f32 to vector<2x32xf32>
    %c0_i32 = arith.constant 0 : i32
    %13 = arith.index_cast %c0_i32 : i32 to index
    %c0_14 = arith.constant 0 : index
    %c0_15 = arith.constant 0 : index
    %14 = vector.load %arg12[%13, %c0_14, %c0_15] : memref<8x2x96xf32, #tpu.memory_space<vmem>>, vector<1x2x96xf32>
    %15 = vector.shape_cast %14 : vector<1x2x96xf32> to vector<2x96xf32>
    %16 = arith.truncf %12 : vector<2x32xf32> to vector<2x32xbf16>
    %cst_16 = arith.constant dense<0.000000e+00> : vector<2x96xf32>
    %17 = tpu.matmul %16, %10, %cst_16 {dimension_numbers = #tpu.dot_dimension_numbers<[1], [0], [0], [1], [0, 0, 1, 1], [], []>} : vector<2x32xbf16>, vector<32x96xbf16>, vector<2x96xf32> -> vector<2x96xf32>
    %18 = vector.broadcast %11 : vector<1x96xf32> to vector<2x96xf32>
    %19 = arith.addf %17, %18 : vector<2x96xf32>
    %20 = vector.extract_strided_slice %15 {offsets = [0, 0], sizes = [2, 32], strides = [1, 1]} : vector<2x96xf32> to vector<2x32xf32>
    %21 = vector.extract_strided_slice %19 {offsets = [0, 0], sizes = [2, 32], strides = [1, 1]} : vector<2x96xf32> to vector<2x32xf32>
    %22 = arith.addf %20, %21 : vector<2x32xf32>
    %23 = arith.negf %22 : vector<2x32xf32>
    %24 = math.exp %23 : vector<2x32xf32>
    %cst_17 = arith.constant 1.000000e+00 : f32
    %25 = vector.broadcast %cst_17 : f32 to vector<2x32xf32>
    %26 = arith.addf %25, %24 : vector<2x32xf32>
    %27 = arith.divf %25, %26 : vector<2x32xf32>
    %28 = vector.extract_strided_slice %15 {offsets = [0, 32], sizes = [2, 32], strides = [1, 1]} : vector<2x96xf32> to vector<2x32xf32>
    %29 = vector.extract_strided_slice %19 {offsets = [0, 32], sizes = [2, 32], strides = [1, 1]} : vector<2x96xf32> to vector<2x32xf32>
    %30 = arith.addf %28, %29 : vector<2x32xf32>
    %31 = arith.negf %30 : vector<2x32xf32>
    %32 = math.exp %31 : vector<2x32xf32>
    %cst_18 = arith.constant 1.000000e+00 : f32
    %33 = vector.broadcast %cst_18 : f32 to vector<2x32xf32>
    %34 = arith.addf %33, %32 : vector<2x32xf32>
    %35 = arith.divf %33, %34 : vector<2x32xf32>
    %36 = vector.extract_strided_slice %15 {offsets = [0, 64], sizes = [2, 32], strides = [1, 1]} : vector<2x96xf32> to vector<2x32xf32>
    %37 = vector.extract_strided_slice %19 {offsets = [0, 64], sizes = [2, 32], strides = [1, 1]} : vector<2x96xf32> to vector<2x32xf32>
    %38 = arith.mulf %27, %37 : vector<2x32xf32>
    %39 = arith.addf %36, %38 : vector<2x32xf32>
    %40 = math.tanh %39 : vector<2x32xf32>
    %cst_19 = arith.constant 1.000000e+00 : f32
    %41 = vector.broadcast %cst_19 : f32 to vector<2x32xf32>
    %42 = arith.subf %41, %35 : vector<2x32xf32>
    %43 = arith.mulf %42, %40 : vector<2x32xf32>
    %44 = arith.mulf %35, %12 : vector<2x32xf32>
    %45 = arith.addf %43, %44 : vector<2x32xf32>
    %46 = arith.index_cast %c0_i32 : i32 to index
    %c0_20 = arith.constant 0 : index
    %c0_21 = arith.constant 0 : index
    %47 = vector.load %arg13[%46, %c0_20, %c0_21] : memref<8x2x32xf32, #tpu.memory_space<vmem>>, vector<1x2x32xf32>
    %48 = vector.shape_cast %47 : vector<1x2x32xf32> to vector<2x32xf32>
    %49 = vector.shape_cast %45 : vector<2x32xf32> to vector<1x2x32xf32>
    tpu.vector_store %arg13[%46, %c0_20, %c0_21], %49 {strides = array<i32>} : memref<8x2x32xf32, #tpu.memory_space<vmem>>, vector<1x2x32xf32>,
    %c1_i32 = arith.constant 1 : i32
    %50 = arith.index_cast %c1_i32 : i32 to index
    %c0_22 = arith.constant 0 : index
    %c0_23 = arith.constant 0 : index
    %51 = vector.load %arg12[%50, %c0_22, %c0_23] : memref<8x2x96xf32, #tpu.memory_space<vmem>>, vector<1x2x96xf32>
    %52 = vector.shape_cast %51 : vector<1x2x96xf32> to vector<2x96xf32>
    %53 = arith.truncf %45 : vector<2x32xf32> to vector<2x32xbf16>
    %cst_24 = arith.constant dense<0.000000e+00> : vector<2x96xf32>
    %54 = tpu.matmul %53, %10, %cst_24 {dimension_numbers = #tpu.dot_dimension_numbers<[1], [0], [0], [1], [0, 0, 1, 1], [], []>} : vector<2x32xbf16>, vector<32x96xbf16>, vector<2x96xf32> -> vector<2x96xf32>
    %55 = vector.broadcast %11 : vector<1x96xf32> to vector<2x96xf32>
    %56 = arith.addf %54, %55 : vector<2x96xf32>
    %57 = vector.extract_strided_slice %52 {offsets = [0, 0], sizes = [2, 32], strides = [1, 1]} : vector<2x96xf32> to vector<2x32xf32>
    %58 = vector.extract_strided_slice %56 {offsets = [0, 0], sizes = [2, 32], strides = [1, 1]} : vector<2x96xf32> to vector<2x32xf32>
    %59 = arith.addf %57, %58 : vector<2x32xf32>
    %60 = arith.negf %59 : vector<2x32xf32>
    %61 = math.exp %60 : vector<2x32xf32>
    %cst_25 = arith.constant 1.000000e+00 : f32
    %62 = vector.broadcast %cst_25 : f32 to vector<2x32xf32>
    %63 = arith.addf %62, %61 : vector<2x32xf32>
    %64 = arith.divf %62, %63 : vector<2x32xf32>
    %65 = vector.extract_strided_slice %52 {offsets = [0, 32], sizes = [2, 32], strides = [1, 1]} : vector<2x96xf32> to vector<2x32xf32>
    %66 = vector.extract_strided_slice %56 {offsets = [0, 32], sizes = [2, 32], strides = [1, 1]} : vector<2x96xf32> to vector<2x32xf32>
    %67 = arith.addf %65, %66 : vector<2x32xf32>
    %68 = arith.negf %67 : vector<2x32xf32>
    %69 = math.exp %68 : vector<2x32xf32>
    %cst_26 = arith.constant 1.000000e+00 : f32
    %70 = vector.broadcast %cst_26 : f32 to vector<2x32xf32>
    %71 = arith.addf %70, %69 : vector<2x32xf32>
    %72 = arith.divf %70, %71 : vector<2x32xf32>
    %73 = vector.extract_strided_slice %52 {offsets = [0, 64], sizes = [2, 32], strides = [1, 1]} : vector<2x96xf32> to vector<2x32xf32>
    %74 = vector.extract_strided_slice %56 {offsets = [0, 64], sizes = [2, 32], strides = [1, 1]} : vector<2x96xf32> to vector<2x32xf32>
    %75 = arith.mulf %64, %74 : vector<2x32xf32>
    %76 = arith.addf %73, %75 : vector<2x32xf32>
    %77 = math.tanh %76 : vector<2x32xf32>
    %cst_27 = arith.constant 1.000000e+00 : f32
    %78 = vector.broadcast %cst_27 : f32 to vector<2x32xf32>
    %79 = arith.subf %78, %72 : vector<2x32xf32>
    %80 = arith.mulf %79, %77 : vector<2x32xf32>
    %81 = arith.mulf %72, %45 : vector<2x32xf32>
    %82 = arith.addf %80, %81 : vector<2x32xf32>
    %83 = arith.index_cast %c1_i32 : i32 to index
    %c0_28 = arith.constant 0 : index
    %c0_29 = arith.constant 0 : index
    %84 = vector.load %arg13[%83, %c0_28, %c0_29] : memref<8x2x32xf32, #tpu.memory_space<vmem>>, vector<1x2x32xf32>
    %85 = vector.shape_cast %84 : vector<1x2x32xf32> to vector<2x32xf32>
    %86 = vector.shape_cast %82 : vector<2x32xf32> to vector<1x2x32xf32>
    tpu.vector_store %arg13[%83, %c0_28, %c0_29], %86 {strides = array<i32>} : memref<8x2x32xf32, #tpu.memory_space<vmem>>, vector<1x2x32xf32>,
    %c2_i32 = arith.constant 2 : i32
    %87 = arith.index_cast %c2_i32 : i32 to index
    %c0_30 = arith.constant 0 : index
    %c0_31 = arith.constant 0 : index
    %88 = vector.load %arg12[%87, %c0_30, %c0_31] : memref<8x2x96xf32, #tpu.memory_space<vmem>>, vector<1x2x96xf32>
    %89 = vector.shape_cast %88 : vector<1x2x96xf32> to vector<2x96xf32>
    %90 = arith.truncf %82 : vector<2x32xf32> to vector<2x32xbf16>
    %cst_32 = arith.constant dense<0.000000e+00> : vector<2x96xf32>
    %91 = tpu.matmul %90, %10, %cst_32 {dimension_numbers = #tpu.dot_dimension_numbers<[1], [0], [0], [1], [0, 0, 1, 1], [], []>} : vector<2x32xbf16>, vector<32x96xbf16>, vector<2x96xf32> -> vector<2x96xf32>
    %92 = vector.broadcast %11 : vector<1x96xf32> to vector<2x96xf32>
    %93 = arith.addf %91, %92 : vector<2x96xf32>
    %94 = vector.extract_strided_slice %89 {offsets = [0, 0], sizes = [2, 32], strides = [1, 1]} : vector<2x96xf32> to vector<2x32xf32>
    %95 = vector.extract_strided_slice %93 {offsets = [0, 0], sizes = [2, 32], strides = [1, 1]} : vector<2x96xf32> to vector<2x32xf32>
    %96 = arith.addf %94, %95 : vector<2x32xf32>
    %97 = arith.negf %96 : vector<2x32xf32>
    %98 = math.exp %97 : vector<2x32xf32>
    %cst_33 = arith.constant 1.000000e+00 : f32
    %99 = vector.broadcast %cst_33 : f32 to vector<2x32xf32>
    %100 = arith.addf %99, %98 : vector<2x32xf32>
    %101 = arith.divf %99, %100 : vector<2x32xf32>
    %102 = vector.extract_strided_slice %89 {offsets = [0, 32], sizes = [2, 32], strides = [1, 1]} : vector<2x96xf32> to vector<2x32xf32>
    %103 = vector.extract_strided_slice %93 {offsets = [0, 32], sizes = [2, 32], strides = [1, 1]} : vector<2x96xf32> to vector<2x32xf32>
    %104 = arith.addf %102, %103 : vector<2x32xf32>
    %105 = arith.negf %104 : vector<2x32xf32>
    %106 = math.exp %105 : vector<2x32xf32>
    %cst_34 = arith.constant 1.000000e+00 : f32
    %107 = vector.broadcast %cst_34 : f32 to vector<2x32xf32>
    %108 = arith.addf %107, %106 : vector<2x32xf32>
    %109 = arith.divf %107, %108 : vector<2x32xf32>
    %110 = vector.extract_strided_slice %89 {offsets = [0, 64], sizes = [2, 32], strides = [1, 1]} : vector<2x96xf32> to vector<2x32xf32>
    %111 = vector.extract_strided_slice %93 {offsets = [0, 64], sizes = [2, 32], strides = [1, 1]} : vector<2x96xf32> to vector<2x32xf32>
    %112 = arith.mulf %101, %111 : vector<2x32xf32>
    %113 = arith.addf %110, %112 : vector<2x32xf32>
    %114 = math.tanh %113 : vector<2x32xf32>
    %cst_35 = arith.constant 1.000000e+00 : f32
    %115 = vector.broadcast %cst_35 : f32 to vector<2x32xf32>
    %116 = arith.subf %115, %109 : vector<2x32xf32>
    %117 = arith.mulf %116, %114 : vector<2x32xf32>
    %118 = arith.mulf %109, %82 : vector<2x32xf32>
    %119 = arith.addf %117, %118 : vector<2x32xf32>
    %120 = arith.index_cast %c2_i32 : i32 to index
    %c0_36 = arith.constant 0 : index
    %c0_37 = arith.constant 0 : index
    %121 = vector.load %arg13[%120, %c0_36, %c0_37] : memref<8x2x32xf32, #tpu.memory_space<vmem>>, vector<1x2x32xf32>
    %122 = vector.shape_cast %121 : vector<1x2x32xf32> to vector<2x32xf32>
    %123 = vector.shape_cast %119 : vector<2x32xf32> to vector<1x2x32xf32>
    tpu.vector_store %arg13[%120, %c0_36, %c0_37], %123 {strides = array<i32>} : memref<8x2x32xf32, #tpu.memory_space<vmem>>, vector<1x2x32xf32>,
    %c3_i32 = arith.constant 3 : i32
    %124 = arith.index_cast %c3_i32 : i32 to index
    %c0_38 = arith.constant 0 : index
    %c0_39 = arith.constant 0 : index
    %125 = vector.load %arg12[%124, %c0_38, %c0_39] : memref<8x2x96xf32, #tpu.memory_space<vmem>>, vector<1x2x96xf32>
    %126 = vector.shape_cast %125 : vector<1x2x96xf32> to vector<2x96xf32>
    %127 = arith.truncf %119 : vector<2x32xf32> to vector<2x32xbf16>
    %cst_40 = arith.constant dense<0.000000e+00> : vector<2x96xf32>
    %128 = tpu.matmul %127, %10, %cst_40 {dimension_numbers = #tpu.dot_dimension_numbers<[1], [0], [0], [1], [0, 0, 1, 1], [], []>} : vector<2x32xbf16>, vector<32x96xbf16>, vector<2x96xf32> -> vector<2x96xf32>
    %129 = vector.broadcast %11 : vector<1x96xf32> to vector<2x96xf32>
    %130 = arith.addf %128, %129 : vector<2x96xf32>
    %131 = vector.extract_strided_slice %126 {offsets = [0, 0], sizes = [2, 32], strides = [1, 1]} : vector<2x96xf32> to vector<2x32xf32>
    %132 = vector.extract_strided_slice %130 {offsets = [0, 0], sizes = [2, 32], strides = [1, 1]} : vector<2x96xf32> to vector<2x32xf32>
    %133 = arith.addf %131, %132 : vector<2x32xf32>
    %134 = arith.negf %133 : vector<2x32xf32>
    %135 = math.exp %134 : vector<2x32xf32>
    %cst_41 = arith.constant 1.000000e+00 : f32
    %136 = vector.broadcast %cst_41 : f32 to vector<2x32xf32>
    %137 = arith.addf %136, %135 : vector<2x32xf32>
    %138 = arith.divf %136, %137 : vector<2x32xf32>
    %139 = vector.extract_strided_slice %126 {offsets = [0, 32], sizes = [2, 32], strides = [1, 1]} : vector<2x96xf32> to vector<2x32xf32>
    %140 = vector.extract_strided_slice %130 {offsets = [0, 32], sizes = [2, 32], strides = [1, 1]} : vector<2x96xf32> to vector<2x32xf32>
    %141 = arith.addf %139, %140 : vector<2x32xf32>
    %142 = arith.negf %141 : vector<2x32xf32>
    %143 = math.exp %142 : vector<2x32xf32>
    %cst_42 = arith.constant 1.000000e+00 : f32
    %144 = vector.broadcast %cst_42 : f32 to vector<2x32xf32>
    %145 = arith.addf %144, %143 : vector<2x32xf32>
    %146 = arith.divf %144, %145 : vector<2x32xf32>
    %147 = vector.extract_strided_slice %126 {offsets = [0, 64], sizes = [2, 32], strides = [1, 1]} : vector<2x96xf32> to vector<2x32xf32>
    %148 = vector.extract_strided_slice %130 {offsets = [0, 64], sizes = [2, 32], strides = [1, 1]} : vector<2x96xf32> to vector<2x32xf32>
    %149 = arith.mulf %138, %148 : vector<2x32xf32>
    %150 = arith.addf %147, %149 : vector<2x32xf32>
    %151 = math.tanh %150 : vector<2x32xf32>
    %cst_43 = arith.constant 1.000000e+00 : f32
    %152 = vector.broadcast %cst_43 : f32 to vector<2x32xf32>
    %153 = arith.subf %152, %146 : vector<2x32xf32>
    %154 = arith.mulf %153, %151 : vector<2x32xf32>
    %155 = arith.mulf %146, %119 : vector<2x32xf32>
    %156 = arith.addf %154, %155 : vector<2x32xf32>
    %157 = arith.index_cast %c3_i32 : i32 to index
    %c0_44 = arith.constant 0 : index
    %c0_45 = arith.constant 0 : index
    %158 = vector.load %arg13[%157, %c0_44, %c0_45] : memref<8x2x32xf32, #tpu.memory_space<vmem>>, vector<1x2x32xf32>
    %159 = vector.shape_cast %158 : vector<1x2x32xf32> to vector<2x32xf32>
    %160 = vector.shape_cast %156 : vector<2x32xf32> to vector<1x2x32xf32>
    tpu.vector_store %arg13[%157, %c0_44, %c0_45], %160 {strides = array<i32>} : memref<8x2x32xf32, #tpu.memory_space<vmem>>, vector<1x2x32xf32>,
    %c4_i32 = arith.constant 4 : i32
    %161 = arith.index_cast %c4_i32 : i32 to index
    %c0_46 = arith.constant 0 : index
    %c0_47 = arith.constant 0 : index
    %162 = vector.load %arg12[%161, %c0_46, %c0_47] : memref<8x2x96xf32, #tpu.memory_space<vmem>>, vector<1x2x96xf32>
    %163 = vector.shape_cast %162 : vector<1x2x96xf32> to vector<2x96xf32>
    %164 = arith.truncf %156 : vector<2x32xf32> to vector<2x32xbf16>
    %cst_48 = arith.constant dense<0.000000e+00> : vector<2x96xf32>
    %165 = tpu.matmul %164, %10, %cst_48 {dimension_numbers = #tpu.dot_dimension_numbers<[1], [0], [0], [1], [0, 0, 1, 1], [], []>} : vector<2x32xbf16>, vector<32x96xbf16>, vector<2x96xf32> -> vector<2x96xf32>
    %166 = vector.broadcast %11 : vector<1x96xf32> to vector<2x96xf32>
    %167 = arith.addf %165, %166 : vector<2x96xf32>
    %168 = vector.extract_strided_slice %163 {offsets = [0, 0], sizes = [2, 32], strides = [1, 1]} : vector<2x96xf32> to vector<2x32xf32>
    %169 = vector.extract_strided_slice %167 {offsets = [0, 0], sizes = [2, 32], strides = [1, 1]} : vector<2x96xf32> to vector<2x32xf32>
    %170 = arith.addf %168, %169 : vector<2x32xf32>
    %171 = arith.negf %170 : vector<2x32xf32>
    %172 = math.exp %171 : vector<2x32xf32>
    %cst_49 = arith.constant 1.000000e+00 : f32
    %173 = vector.broadcast %cst_49 : f32 to vector<2x32xf32>
    %174 = arith.addf %173, %172 : vector<2x32xf32>
    %175 = arith.divf %173, %174 : vector<2x32xf32>
    %176 = vector.extract_strided_slice %163 {offsets = [0, 32], sizes = [2, 32], strides = [1, 1]} : vector<2x96xf32> to vector<2x32xf32>
    %177 = vector.extract_strided_slice %167 {offsets = [0, 32], sizes = [2, 32], strides = [1, 1]} : vector<2x96xf32> to vector<2x32xf32>
    %178 = arith.addf %176, %177 : vector<2x32xf32>
    %179 = arith.negf %178 : vector<2x32xf32>
    %180 = math.exp %179 : vector<2x32xf32>
    %cst_50 = arith.constant 1.000000e+00 : f32
    %181 = vector.broadcast %cst_50 : f32 to vector<2x32xf32>
    %182 = arith.addf %181, %180 : vector<2x32xf32>
    %183 = arith.divf %181, %182 : vector<2x32xf32>
    %184 = vector.extract_strided_slice %163 {offsets = [0, 64], sizes = [2, 32], strides = [1, 1]} : vector<2x96xf32> to vector<2x32xf32>
    %185 = vector.extract_strided_slice %167 {offsets = [0, 64], sizes = [2, 32], strides = [1, 1]} : vector<2x96xf32> to vector<2x32xf32>
    %186 = arith.mulf %175, %185 : vector<2x32xf32>
    %187 = arith.addf %184, %186 : vector<2x32xf32>
    %188 = math.tanh %187 : vector<2x32xf32>
    %cst_51 = arith.constant 1.000000e+00 : f32
    %189 = vector.broadcast %cst_51 : f32 to vector<2x32xf32>
    %190 = arith.subf %189, %183 : vector<2x32xf32>
    %191 = arith.mulf %190, %188 : vector<2x32xf32>
    %192 = arith.mulf %183, %156 : vector<2x32xf32>
    %193 = arith.addf %191, %192 : vector<2x32xf32>
    %194 = arith.index_cast %c4_i32 : i32 to index
    %c0_52 = arith.constant 0 : index
    %c0_53 = arith.constant 0 : index
    %195 = vector.load %arg13[%194, %c0_52, %c0_53] : memref<8x2x32xf32, #tpu.memory_space<vmem>>, vector<1x2x32xf32>
    %196 = vector.shape_cast %195 : vector<1x2x32xf32> to vector<2x32xf32>
    %197 = vector.shape_cast %193 : vector<2x32xf32> to vector<1x2x32xf32>
    tpu.vector_store %arg13[%194, %c0_52, %c0_53], %197 {strides = array<i32>} : memref<8x2x32xf32, #tpu.memory_space<vmem>>, vector<1x2x32xf32>,
    %c5_i32 = arith.constant 5 : i32
    %198 = arith.index_cast %c5_i32 : i32 to index
    %c0_54 = arith.constant 0 : index
    %c0_55 = arith.constant 0 : index
    %199 = vector.load %arg12[%198, %c0_54, %c0_55] : memref<8x2x96xf32, #tpu.memory_space<vmem>>, vector<1x2x96xf32>
    %200 = vector.shape_cast %199 : vector<1x2x96xf32> to vector<2x96xf32>
    %201 = arith.truncf %193 : vector<2x32xf32> to vector<2x32xbf16>
    %cst_56 = arith.constant dense<0.000000e+00> : vector<2x96xf32>
    %202 = tpu.matmul %201, %10, %cst_56 {dimension_numbers = #tpu.dot_dimension_numbers<[1], [0], [0], [1], [0, 0, 1, 1], [], []>} : vector<2x32xbf16>, vector<32x96xbf16>, vector<2x96xf32> -> vector<2x96xf32>
    %203 = vector.broadcast %11 : vector<1x96xf32> to vector<2x96xf32>
    %204 = arith.addf %202, %203 : vector<2x96xf32>
    %205 = vector.extract_strided_slice %200 {offsets = [0, 0], sizes = [2, 32], strides = [1, 1]} : vector<2x96xf32> to vector<2x32xf32>
    %206 = vector.extract_strided_slice %204 {offsets = [0, 0], sizes = [2, 32], strides = [1, 1]} : vector<2x96xf32> to vector<2x32xf32>
    %207 = arith.addf %205, %206 : vector<2x32xf32>
    %208 = arith.negf %207 : vector<2x32xf32>
    %209 = math.exp %208 : vector<2x32xf32>
    %cst_57 = arith.constant 1.000000e+00 : f32
    %210 = vector.broadcast %cst_57 : f32 to vector<2x32xf32>
    %211 = arith.addf %210, %209 : vector<2x32xf32>
    %212 = arith.divf %210, %211 : vector<2x32xf32>
    %213 = vector.extract_strided_slice %200 {offsets = [0, 32], sizes = [2, 32], strides = [1, 1]} : vector<2x96xf32> to vector<2x32xf32>
    %214 = vector.extract_strided_slice %204 {offsets = [0, 32], sizes = [2, 32], strides = [1, 1]} : vector<2x96xf32> to vector<2x32xf32>
    %215 = arith.addf %213, %214 : vector<2x32xf32>
    %216 = arith.negf %215 : vector<2x32xf32>
    %217 = math.exp %216 : vector<2x32xf32>
    %cst_58 = arith.constant 1.000000e+00 : f32
    %218 = vector.broadcast %cst_58 : f32 to vector<2x32xf32>
    %219 = arith.addf %218, %217 : vector<2x32xf32>
    %220 = arith.divf %218, %219 : vector<2x32xf32>
    %221 = vector.extract_strided_slice %200 {offsets = [0, 64], sizes = [2, 32], strides = [1, 1]} : vector<2x96xf32> to vector<2x32xf32>
    %222 = vector.extract_strided_slice %204 {offsets = [0, 64], sizes = [2, 32], strides = [1, 1]} : vector<2x96xf32> to vector<2x32xf32>
    %223 = arith.mulf %212, %222 : vector<2x32xf32>
    %224 = arith.addf %221, %223 : vector<2x32xf32>
    %225 = math.tanh %224 : vector<2x32xf32>
    %cst_59 = arith.constant 1.000000e+00 : f32
    %226 = vector.broadcast %cst_59 : f32 to vector<2x32xf32>
    %227 = arith.subf %226, %220 : vector<2x32xf32>
    %228 = arith.mulf %227, %225 : vector<2x32xf32>
    %229 = arith.mulf %220, %193 : vector<2x32xf32>
    %230 = arith.addf %228, %229 : vector<2x32xf32>
    %231 = arith.index_cast %c5_i32 : i32 to index
    %c0_60 = arith.constant 0 : index
    %c0_61 = arith.constant 0 : index
    %232 = vector.load %arg13[%231, %c0_60, %c0_61] : memref<8x2x32xf32, #tpu.memory_space<vmem>>, vector<1x2x32xf32>
    %233 = vector.shape_cast %232 : vector<1x2x32xf32> to vector<2x32xf32>
    %234 = vector.shape_cast %230 : vector<2x32xf32> to vector<1x2x32xf32>
    tpu.vector_store %arg13[%231, %c0_60, %c0_61], %234 {strides = array<i32>} : memref<8x2x32xf32, #tpu.memory_space<vmem>>, vector<1x2x32xf32>,
    %c6_i32 = arith.constant 6 : i32
    %235 = arith.index_cast %c6_i32 : i32 to index
    %c0_62 = arith.constant 0 : index
    %c0_63 = arith.constant 0 : index
    %236 = vector.load %arg12[%235, %c0_62, %c0_63] : memref<8x2x96xf32, #tpu.memory_space<vmem>>, vector<1x2x96xf32>
    %237 = vector.shape_cast %236 : vector<1x2x96xf32> to vector<2x96xf32>
    %238 = arith.truncf %230 : vector<2x32xf32> to vector<2x32xbf16>
    %cst_64 = arith.constant dense<0.000000e+00> : vector<2x96xf32>
    %239 = tpu.matmul %238, %10, %cst_64 {dimension_numbers = #tpu.dot_dimension_numbers<[1], [0], [0], [1], [0, 0, 1, 1], [], []>} : vector<2x32xbf16>, vector<32x96xbf16>, vector<2x96xf32> -> vector<2x96xf32>
    %240 = vector.broadcast %11 : vector<1x96xf32> to vector<2x96xf32>
    %241 = arith.addf %239, %240 : vector<2x96xf32>
    %242 = vector.extract_strided_slice %237 {offsets = [0, 0], sizes = [2, 32], strides = [1, 1]} : vector<2x96xf32> to vector<2x32xf32>
    %243 = vector.extract_strided_slice %241 {offsets = [0, 0], sizes = [2, 32], strides = [1, 1]} : vector<2x96xf32> to vector<2x32xf32>
    %244 = arith.addf %242, %243 : vector<2x32xf32>
    %245 = arith.negf %244 : vector<2x32xf32>
    %246 = math.exp %245 : vector<2x32xf32>
    %cst_65 = arith.constant 1.000000e+00 : f32
    %247 = vector.broadcast %cst_65 : f32 to vector<2x32xf32>
    %248 = arith.addf %247, %246 : vector<2x32xf32>
    %249 = arith.divf %247, %248 : vector<2x32xf32>
    %250 = vector.extract_strided_slice %237 {offsets = [0, 32], sizes = [2, 32], strides = [1, 1]} : vector<2x96xf32> to vector<2x32xf32>
    %251 = vector.extract_strided_slice %241 {offsets = [0, 32], sizes = [2, 32], strides = [1, 1]} : vector<2x96xf32> to vector<2x32xf32>
    %252 = arith.addf %250, %251 : vector<2x32xf32>
    %253 = arith.negf %252 : vector<2x32xf32>
    %254 = math.exp %253 : vector<2x32xf32>
    %cst_66 = arith.constant 1.000000e+00 : f32
    %255 = vector.broadcast %cst_66 : f32 to vector<2x32xf32>
    %256 = arith.addf %255, %254 : vector<2x32xf32>
    %257 = arith.divf %255, %256 : vector<2x32xf32>
    %258 = vector.extract_strided_slice %237 {offsets = [0, 64], sizes = [2, 32], strides = [1, 1]} : vector<2x96xf32> to vector<2x32xf32>
    %259 = vector.extract_strided_slice %241 {offsets = [0, 64], sizes = [2, 32], strides = [1, 1]} : vector<2x96xf32> to vector<2x32xf32>
    %260 = arith.mulf %249, %259 : vector<2x32xf32>
    %261 = arith.addf %258, %260 : vector<2x32xf32>
    %262 = math.tanh %261 : vector<2x32xf32>
    %cst_67 = arith.constant 1.000000e+00 : f32
    %263 = vector.broadcast %cst_67 : f32 to vector<2x32xf32>
    %264 = arith.subf %263, %257 : vector<2x32xf32>
    %265 = arith.mulf %264, %262 : vector<2x32xf32>
    %266 = arith.mulf %257, %230 : vector<2x32xf32>
    %267 = arith.addf %265, %266 : vector<2x32xf32>
    %268 = arith.index_cast %c6_i32 : i32 to index
    %c0_68 = arith.constant 0 : index
    %c0_69 = arith.constant 0 : index
    %269 = vector.load %arg13[%268, %c0_68, %c0_69] : memref<8x2x32xf32, #tpu.memory_space<vmem>>, vector<1x2x32xf32>
    %270 = vector.shape_cast %269 : vector<1x2x32xf32> to vector<2x32xf32>
    %271 = vector.shape_cast %267 : vector<2x32xf32> to vector<1x2x32xf32>
    tpu.vector_store %arg13[%268, %c0_68, %c0_69], %271 {strides = array<i32>} : memref<8x2x32xf32, #tpu.memory_space<vmem>>, vector<1x2x32xf32>,
    %c7_i32 = arith.constant 7 : i32
    %272 = arith.index_cast %c7_i32 : i32 to index
    %c0_70 = arith.constant 0 : index
    %c0_71 = arith.constant 0 : index
    %273 = vector.load %arg12[%272, %c0_70, %c0_71] : memref<8x2x96xf32, #tpu.memory_space<vmem>>, vector<1x2x96xf32>
    %274 = vector.shape_cast %273 : vector<1x2x96xf32> to vector<2x96xf32>
    %275 = arith.truncf %267 : vector<2x32xf32> to vector<2x32xbf16>
    %cst_72 = arith.constant dense<0.000000e+00> : vector<2x96xf32>
    %276 = tpu.matmul %275, %10, %cst_72 {dimension_numbers = #tpu.dot_dimension_numbers<[1], [0], [0], [1], [0, 0, 1, 1], [], []>} : vector<2x32xbf16>, vector<32x96xbf16>, vector<2x96xf32> -> vector<2x96xf32>
    %277 = vector.broadcast %11 : vector<1x96xf32> to vector<2x96xf32>
    %278 = arith.addf %276, %277 : vector<2x96xf32>
    %279 = vector.extract_strided_slice %274 {offsets = [0, 0], sizes = [2, 32], strides = [1, 1]} : vector<2x96xf32> to vector<2x32xf32>
    %280 = vector.extract_strided_slice %278 {offsets = [0, 0], sizes = [2, 32], strides = [1, 1]} : vector<2x96xf32> to vector<2x32xf32>
    %281 = arith.addf %279, %280 : vector<2x32xf32>
    %282 = arith.negf %281 : vector<2x32xf32>
    %283 = math.exp %282 : vector<2x32xf32>
    %cst_73 = arith.constant 1.000000e+00 : f32
    %284 = vector.broadcast %cst_73 : f32 to vector<2x32xf32>
    %285 = arith.addf %284, %283 : vector<2x32xf32>
    %286 = arith.divf %284, %285 : vector<2x32xf32>
    %287 = vector.extract_strided_slice %274 {offsets = [0, 32], sizes = [2, 32], strides = [1, 1]} : vector<2x96xf32> to vector<2x32xf32>
    %288 = vector.extract_strided_slice %278 {offsets = [0, 32], sizes = [2, 32], strides = [1, 1]} : vector<2x96xf32> to vector<2x32xf32>
    %289 = arith.addf %287, %288 : vector<2x32xf32>
    %290 = arith.negf %289 : vector<2x32xf32>
    %291 = math.exp %290 : vector<2x32xf32>
    %cst_74 = arith.constant 1.000000e+00 : f32
    %292 = vector.broadcast %cst_74 : f32 to vector<2x32xf32>
    %293 = arith.addf %292, %291 : vector<2x32xf32>
    %294 = arith.divf %292, %293 : vector<2x32xf32>
    %295 = vector.extract_strided_slice %274 {offsets = [0, 64], sizes = [2, 32], strides = [1, 1]} : vector<2x96xf32> to vector<2x32xf32>
    %296 = vector.extract_strided_slice %278 {offsets = [0, 64], sizes = [2, 32], strides = [1, 1]} : vector<2x96xf32> to vector<2x32xf32>
    %297 = arith.mulf %286, %296 : vector<2x32xf32>
    %298 = arith.addf %295, %297 : vector<2x32xf32>
    %299 = math.tanh %298 : vector<2x32xf32>
    %cst_75 = arith.constant 1.000000e+00 : f32
    %300 = vector.broadcast %cst_75 : f32 to vector<2x32xf32>
    %301 = arith.subf %300, %294 : vector<2x32xf32>
    %302 = arith.mulf %301, %299 : vector<2x32xf32>
    %303 = arith.mulf %294, %267 : vector<2x32xf32>
    %304 = arith.addf %302, %303 : vector<2x32xf32>
    %305 = arith.index_cast %c7_i32 : i32 to index
    %c0_76 = arith.constant 0 : index
    %c0_77 = arith.constant 0 : index
    %306 = vector.load %arg13[%305, %c0_76, %c0_77] : memref<8x2x32xf32, #tpu.memory_space<vmem>>, vector<1x2x32xf32>
    %307 = vector.shape_cast %306 : vector<1x2x32xf32> to vector<2x32xf32>
    %308 = vector.shape_cast %304 : vector<2x32xf32> to vector<1x2x32xf32>
    tpu.vector_store %arg13[%305, %c0_76, %c0_77], %308 {strides = array<i32>} : memref<8x2x32xf32, #tpu.memory_space<vmem>>, vector<1x2x32xf32>,
    %c8_i32 = arith.constant 8 : i32
    %c0_78 = arith.constant 0 : index
    %c0_79 = arith.constant 0 : index
    %309 = vector.load %arg11[%c0_78, %c0_79] : memref<2x32xf32, #tpu.memory_space<vmem>>, vector<2x32xf32>
    tpu.vector_store %arg11[%c0_78, %c0_79], %304 {strides = array<i32>} : memref<2x32xf32, #tpu.memory_space<vmem>>, vector<2x32xf32>,
    %c0_80 = arith.constant 0 : index
    %c0_81 = arith.constant 0 : index
    %c0_82 = arith.constant 0 : index
    %310 = vector.load %arg13[%c0_80, %c0_81, %c0_82] : memref<8x2x32xf32, #tpu.memory_space<vmem>>, vector<8x2x32xf32>
    %311 = tpu.transpose %310, [1, 0, 2] : vector<8x2x32xf32> -> vector<2x8x32xf32>
    %c0_83 = arith.constant 0 : index
    %c0_84 = arith.constant 0 : index
    %c0_85 = arith.constant 0 : index
    %312 = vector.load %arg3[%c0_83, %c0_84, %c0_85] : memref<2x128x32xbf16, #tpu.memory_space<vmem>>, vector<2x128x32xbf16>
    %313 = vector.shape_cast %312 : vector<2x128x32xbf16> to vector<256x32xbf16>
    %c0_86 = arith.constant 0 : index
    %c0_87 = arith.constant 0 : index
    %314 = vector.load %arg8[%c0_86, %c0_87] : memref<32x32xbf16, #tpu.memory_space<vmem>>, vector<32x32xbf16>
    %cst_88 = arith.constant dense<0.000000e+00> : vector<256x32xf32>
    %315 = tpu.matmul %313, %314, %cst_88 {dimension_numbers = #tpu.dot_dimension_numbers<[1], [0], [0], [1], [0, 0, 1, 1], [], []>} : vector<256x32xbf16>, vector<32x32xbf16>, vector<256x32xf32> -> vector<256x32xf32>
    %316 = vector.shape_cast %315 : vector<256x32xf32> to vector<2x128x32xf32>
    %317 = arith.truncf %316 : vector<2x128x32xf32> to vector<2x128x32xbf16>
    %318 = arith.truncf %311 : vector<2x8x32xf32> to vector<2x8x32xbf16>
    "tpu.trace_start"() <{level = 10 : i32, message = "bth,blh->btl"}> : () -> ()
    %cst_89 = arith.constant dense<0.000000e+00> : vector<2x8x128xf32>
    %319 = tpu.matmul %318, %317, %cst_89 {dimension_numbers = #tpu.dot_dimension_numbers<[2], [2], [1], [1], [0, 0, 0, 1, 1, 1], [0], [0]>} : vector<2x8x32xbf16>, vector<2x128x32xbf16>, vector<2x8x128xf32> -> vector<2x8x128xf32>
    "tpu.trace_stop"() : () -> ()
    %c0_90 = arith.constant 0 : index
    %c0_91 = arith.constant 0 : index
    %320 = vector.load %arg1[%c0_90, %c0_91] : memref<2x1xi32, #tpu.memory_space<vmem>>, vector<2x1xi32>
    %321 = vector.shape_cast %320 : vector<2x1xi32> to vector<2x1x1xi32>
    %322 = tpu.iota {dimensions = array<i32: 2>} : vector<2x8x128xi32>
    %323 = vector.broadcast %321 : vector<2x1x1xi32> to vector<2x8x128xi32>
    %324 = arith.cmpi slt, %322, %323 : vector<2x8x128xi32>
    %cst_92 = arith.constant -1.000000e+30 : f32
    %325 = vector.broadcast %cst_92 : f32 to vector<2x8x128xf32>
    %326 = arith.select %324, %319, %325 : vector<2x8x128xi1>, vector<2x8x128xf32>
    %cst_93 = arith.constant dense<0xFF800000> : vector<2x8xf32>
    %327 = vector.multi_reduction <maximumf>, %326, %cst_93 [2] : vector<2x8x128xf32> to vector<2x8xf32>
    %328 = vector.shape_cast %327 : vector<2x8xf32> to vector<2x8x1xf32>
    %329 = vector.broadcast %328 : vector<2x8x1xf32> to vector<2x8x128xf32>
    %330 = arith.subf %326, %329 : vector<2x8x128xf32>
    %331 = math.exp %330 : vector<2x8x128xf32>
    %cst_94 = arith.constant dense<0.000000e+00> : vector<2x8xf32>
    %332 = vector.multi_reduction <add>, %331, %cst_94 [2] : vector<2x8x128xf32> to vector<2x8xf32>
    %333 = vector.shape_cast %332 : vector<2x8xf32> to vector<2x8x1xf32>
    %334 = tpu.reciprocal %333 : vector<2x8x1xf32> -> vector<2x8x1xf32>
    %335 = vector.broadcast %334 : vector<2x8x1xf32> to vector<2x8x128xf32>
    %336 = arith.mulf %331, %335 : vector<2x8x128xf32>
    %337 = arith.truncf %336 : vector<2x8x128xf32> to vector<2x8x128xbf16>
    "tpu.trace_start"() <{level = 10 : i32, message = "btl,blh->bth"}> : () -> ()
    %cst_95 = arith.constant dense<0.000000e+00> : vector<2x8x32xf32>
    %338 = tpu.matmul %337, %312, %cst_95 {dimension_numbers = #tpu.dot_dimension_numbers<[2], [1], [1], [2], [0, 0, 0, 1, 1, 2], [0], [0]>} : vector<2x8x128xbf16>, vector<2x128x32xbf16>, vector<2x8x32xf32> -> vector<2x8x32xf32>
    "tpu.trace_stop"() : () -> ()
    %c0_96 = arith.constant 0 : index
    %c0_97 = arith.constant 0 : index
    %c0_98 = arith.constant 0 : index
    %339 = vector.load %arg10[%c0_96, %c0_97, %c0_98] : memref<2x8x128xf32, #tpu.memory_space<vmem>>, vector<2x8x128xf32>
    tpu.vector_store %arg10[%c0_96, %c0_97, %c0_98], %336 {strides = array<i32>} : memref<2x8x128xf32, #tpu.memory_space<vmem>>, vector<2x8x128xf32>,
    %c0_99 = arith.constant 0 : index
    %c0_100 = arith.constant 0 : index
    %c0_101 = arith.constant 0 : index
    %340 = vector.load %arg9[%c0_99, %c0_100, %c0_101] : memref<2x8x64xf32, #tpu.memory_space<vmem>>, vector<2x8x32xf32>
    tpu.vector_store %arg9[%c0_99, %c0_100, %c0_101], %338 {strides = array<i32>} : memref<2x8x64xf32, #tpu.memory_space<vmem>>, vector<2x8x32xf32>,
    %c0_102 = arith.constant 0 : index
    %c0_103 = arith.constant 0 : index
    %c32 = arith.constant 32 : index
    %341 = vector.load %arg9[%c0_102, %c0_103, %c32] : memref<2x8x64xf32, #tpu.memory_space<vmem>>, vector<2x8x32xf32>
    tpu.vector_store %arg9[%c0_102, %c0_103, %c32], %311 {strides = array<i32>} : memref<2x8x64xf32, #tpu.memory_space<vmem>>, vector<2x8x32xf32>,
    return
  }
  func.func @transform_0(%arg0: i32) -> (i32, i32) {
    %c0_i32 = arith.constant 0 : i32
    %c0_i32_0 = arith.constant 0 : i32
    return %arg0, %c0_i32 : i32, i32
  }
  func.func @transform_1(%arg0: i32) -> (i32, i32, i32) {
    %c0_i32 = arith.constant 0 : i32
    %c0_i32_0 = arith.constant 0 : i32
    %c0_i32_1 = arith.constant 0 : i32
    return %arg0, %c0_i32, %c0_i32_0 : i32, i32, i32
  }
  func.func @transform_2(%arg0: i32) -> (i32, i32, i32) {
    %c0_i32 = arith.constant 0 : i32
    %c0_i32_0 = arith.constant 0 : i32
    %c0_i32_1 = arith.constant 0 : i32
    return %arg0, %c0_i32, %c0_i32_0 : i32, i32, i32
  }
  func.func @transform_3(%arg0: i32) -> (i32, i32) {
    %c0_i32 = arith.constant 0 : i32
    %c0_i32_0 = arith.constant 0 : i32
    %c0_i32_1 = arith.constant 0 : i32
    return %c0_i32, %c0_i32_0 : i32, i32
  }
  func.func @transform_4(%arg0: i32) -> (i32, i32) {
    %c0_i32 = arith.constant 0 : i32
    %c0_i32_0 = arith.constant 0 : i32
    %c0_i32_1 = arith.constant 0 : i32
    return %c0_i32, %c0_i32_0 : i32, i32
  }
  func.func @transform_5(%arg0: i32) -> (i32, i32) {
    %c0_i32 = arith.constant 0 : i32
    %c0_i32_0 = arith.constant 0 : i32
    %c0_i32_1 = arith.constant 0 : i32
    return %c0_i32, %c0_i32_0 : i32, i32
  }
  func.func @transform_6(%arg0: i32) -> (i32, i32) {
    %c0_i32 = arith.constant 0 : i32
    %c0_i32_0 = arith.constant 0 : i32
    %c0_i32_1 = arith.constant 0 : i32
    return %c0_i32, %c0_i32_0 : i32, i32
  }
  func.func @transform_7(%arg0: i32) -> (i32, i32) {
    %c0_i32 = arith.constant 0 : i32
    %c0_i32_0 = arith.constant 0 : i32
    %c0_i32_1 = arith.constant 0 : i32
    return %c0_i32, %c0_i32_0 : i32, i32
  }
  func.func @transform_8(%arg0: i32) -> (i32, i32, i32) {
    %c0_i32 = arith.constant 0 : i32
    %c0_i32_0 = arith.constant 0 : i32
    %c0_i32_1 = arith.constant 0 : i32
    return %arg0, %c0_i32, %c0_i32_0 : i32, i32, i32
  }
  func.func @transform_9(%arg0: i32) -> (i32, i32, i32) {
    %c0_i32 = arith.constant 0 : i32
    %c0_i32_0 = arith.constant 0 : i32
    %c0_i32_1 = arith.constant 0 : i32
    return %arg0, %c0_i32, %c0_i32_0 : i32, i32, i32
  }
  func.func @transform_10(%arg0: i32) -> (i32, i32) {
    %c0_i32 = arith.constant 0 : i32
    %c0_i32_0 = arith.constant 0 : i32
    return %arg0, %c0_i32 : i32, i32
  }
}

</mosaic_0001>

<bundles_post_ra>
// kernel: attention_rnn.1
= control target key start
LH: loop header
LB: loop body
LE: loop exit
PB: predicated region body
PF: predicated region fallthrough
CT: control target
= control target key end

     0   :  { %16 = vsyncpa [#allocation5], 0  ;;  %v1659_v3 = vmov 0   ;;  %vm54_vm0 = vcmask 130048   ;;  %s2072_s0 = inlined_call_operand.vmem [shape: s32[2,1], index: 0, kind: input, shape index: {}]   ;;  %s2073_s1 = inlined_call_operand.vmem [shape: bf16[2,8,16], index: 1, kind: input, shape index: {}]   ;;  %s2074_s2 = inlined_call_operand.vmem [shape: bf16[2,128,32], index: 2, kind: input, shape index: {}]   ;;  %s2075_s3 = inlined_call_operand.vmem [shape: bf16[16,96], index: 3, kind: input, shape index: {}]   ;;  %s2076_s4 = inlined_call_operand.vmem [shape: bf16[32,96], index: 4, kind: input, shape index: {}]   ;;  %s2077_s5 = inlined_call_operand.vmem [shape: f32[1,96], index: 5, kind: input, shape index: {}]   ;;  %s2078_s6 = inlined_call_operand.vmem [shape: f32[1,96], index: 6, kind: input, shape index: {}]   ;;  %s2079_s7 = inlined_call_operand.vmem [shape: bf16[32,32], index: 7, kind: input, shape index: {}]   ;;  %s2080_s8 = inlined_call_operand.hbm [shape: f32[2,8,64], index: 8, kind: output, shape index: {0}]   ;;  %s2081_s9 = inlined_call_operand.hbm [shape: f32[2,8,128], index: 9, kind: output, shape index: {1}]   ;;  %s2082_s10 = inlined_call_operand.hbm [shape: f32[2,32], index: 10, kind: output, shape index: {2}]  }
   0x1   :  { %v1487_v0 = vld [vmem:[%s2075_s3] sm:$0xff]  ;;  %v1489_v1 = vld [vmem:[%s2076_s4 + $0x8] sm:$0xff]  ;;  %1524 = vset.pattern.permute.xlu1 %v1659_v3  ;;  %1523 = vset.pattern.permute.xlu0 %v1659_v3 }
   0x2   :  { %v1486_v2 = vld [vmem:[%s2073_s1] sm:$0xff]  ;;  %65 = vmatpush.bf16.msra.mxu0 %v1487_v0  ;;  %232 = vmatpush.bf16.msra.mxu2 %v1489_v1 }
   0x3   :  { %17 = vsyncpa [#allocation7], 0  ;;  %v1488_v4 = vld [vmem:[%s2076_s4] sm:$0xff]  ;;  %299 = vmatpush.bf16.msra.mxu3 %v1489_v1  ;;  %433 = vmatpush.bf16.msra.mxu1 %v1489_v1  ;;  %v1660_v6 = vmov 1983009808   ;;  %vm73_vm1 = vcmask 1047556  }
   0x4   :  { %v1525_v5 = vld [vmem:[%s2077_s5] ss:$0 sm:$0xff]  ;;  %v76_v7 = vunpack.c.l.s4 %v1660_v6  ;;  %v1661_v12 = vmov 1934713408   ;;  %vm125_vm2 = vcmask 779264   ;;  %s1663_s21 = smov 96  }
   0x5   :  { %1372 = vmatmul.msk.bf16.vlgmr.msra.gmra.mxu0 %vm54_vm0, %v1486_v2  ;;  %v98_v13 = vunpack.c.l.s4 %v1661_v12  ;;  %v1753_v26 = vld [vmem:[%s2078_s6] ss:$0 sm:$0xff]  ;;  %s1662_s6 = smov 64   ;;  %vm155_vm7 = vcmask 261120   ;;  %s1332_s14 = sshll.u32 %s2081_s9, 4  ;;  %s1333_s14 = int_to_ptr.hbm [resolvable:$true] %s1332_s14 }
   0x6   :  { %165 = vmatpush.bf16.msrb.mxu0 %v1489_v1  ;;  %233 = vmatpush.bf16.msra.mxu2 %v1488_v4  ;;  %v1740_v11 = vunpack.c.0.s8 %v76_v7  ;;  %s1665_s15 = smov [#allocation6]   ;;  %s1666_s17 = smov 128  }
   0x7   :  { %300 = vmatpush.bf16.msra.mxu3 %v1488_v4  ;;  %434 = vmatpush.bf16.msra.mxu1 %v1488_v4  ;;  %v1745_v19 = vunpack.c.0.s8 %v98_v13  ;;  %s1330_s16 = sshll.u32 %s1665_s15, 4  ;;  %s1667_s18 = smov 8   ;;  %s1331_s16 = int_to_ptr.vmem [resolvable:$true] %s1330_s16 }
   0x8   :  { %s1668_s19 = smov [#allocation8]   ;;  %s1346_s4 = sshll.u32 %s2082_s10, 4  ;;  %s1347_s4 = int_to_ptr.hbm [resolvable:$true] %s1346_s4 }
   0x9   :  { %s1344_s20 = sshll.u32 %s1668_s19, 4  ;;  %s1669_s9 = smov [#allocation4]   ;;  %s1345_s20 = int_to_ptr.vmem [resolvable:$true] %s1344_s20 }
   0xa   :  { %166 = vmatpush.bf16.msrb.mxu0 %v1488_v4  ;;  %500 = vmatpush.bf16.msrb.mxu2 %v1489_v1  ;;  %s1317_s5 = sshll.u32 %s1669_s9, 4  ;;  %s1319_s24 = sshll.u32 %s2080_s8, 4  ;;  %s1318_s5 = int_to_ptr.vmem [resolvable:$true] %s1317_s5  ;;  %s1320_s24 = int_to_ptr.hbm [resolvable:$true] %s1319_s24 }
   0xb   :  { %567 = vmatpush.bf16.msrb.mxu3 %v1489_v1 }
   0xe   :  { %366 = vmatpush.bf16.msra.mxu0 %v1489_v1  ;;  %501 = vmatpush.bf16.msrb.mxu2 %v1488_v4 }
   0xf   :  { %568 = vmatpush.bf16.msrb.mxu3 %v1488_v4 }
  0x12   :  { %367 = vmatpush.bf16.msra.mxu0 %v1488_v4 }
  0x15   :  { %167 = vmatmul.bf16.vlgmr.msrb.gmra.mxu0 %v1659_v3 }
  0x16   :  { %634 = vmatpush.bf16.msrb.mxu0 %v1489_v1 }
  0x1a   :  { %635 = vmatpush.bf16.msrb.mxu0 %v1488_v4 }
  0x82   :  { %v67_v8 = vpop.f32.mrf.mxu0 }
  0x83   :  { %v68_v9 = vadd.f32 %v1525_v5, %v67_v8 }
  0x85   :  { %v72_v10 = vrot.slane %v68_v9, 4  ;;  %v78_v15 = vperm.slane %v68_v9, %v1740_v11 }
  0x87   :  { %v74_v14 = vsel %vm73_vm1, 0.0, %v72_v10  ;;  %v95_v20 = vrot.slane %v78_v15, 4 }
  0x88   :  { %v82_v18 = vperm.slane %v74_v14, %v1740_v11 }
  0x8a   :  { %v69_v16 = vpop.f32.mrf.mxu0  ;;  %v107_v27 = vrot.slane %v82_v18, 4 }
  0x8b   :  { %v70_v17 = vadd.f32 %v1525_v5, %v69_v16 }
  0x8d   :  { %v83_v21 = vrot.slane %v70_v17, 4  ;;  %v88_v22 = vperm.slane %v70_v17, %v1740_v11 }
  0x8f   :  { %v84_v23 = vsel %vm73_vm1, 0.0, %v83_v21  ;;  %v93_v24 = vrot.slane %v88_v22, 4  ;;  %v96_v25 = vsel %vm73_vm1, %v88_v22, %v95_v20 }
  0x90   :  { %v92_v28 = vperm.slane %v84_v23, %v1740_v11  ;;  %v104_v29 = vperm.slane %v96_v25, %v1745_v19 }
  0x91   :  { %v94_v30 = vsel %vm73_vm1, %v93_v24, %v78_v15 }
  0x92   :  { %v100_v31 = vperm.slane %v94_v30, %v1745_v19  ;;  %v105_v32 = vrot.slane %v92_v28, 4  ;;  %v108_v33 = vsel %vm73_vm1, %v92_v28, %v107_v27  ;;  %v119_v34 = vrot.slane %v104_v29, 4  ;;  %128 = vst.msk [vmem:[#allocation2 + $0x4] sm:$0x3] %vm125_vm2, %v104_v29  ;;  %v168_v35 = vpop.f32.mrf.mxu0 }
  0x93   :  { %v116_v36 = vperm.slane %v108_v33, %v1745_v19  ;;  %v169_v37 = vadd.f32 %v1753_v26, %v168_v35 }
  0x94   :  { %v106_v38 = vsel %vm73_vm1, %v105_v32, %v82_v18  ;;  %v117_v39 = vrot.slane %v100_v31, 4  ;;  %v120_v40 = vsel %vm73_vm1, 0.0, %v119_v34  ;;  %126 = vst.msk [vmem:[#allocation2] sm:$0x3] %vm125_vm2, %v100_v31 }
  0x95   :  { %v112_v41 = vperm.slane %v106_v38, %v1745_v19  ;;  %v123_v42 = vrot.slane %v116_v36, 4  ;;  %129 = vst.msk [vmem:[#allocation2 + $0x6] sm:$0x3] %vm125_vm2, %v120_v40  ;;  %193 = vrot.lane.b32.xlu0 %v169_v37, %s1662_s6 }
  0x96   :  { %v118_v43 = vsel %vm73_vm1, 0.0, %v117_v39  ;;  %132 = vst.msk [vmem:[#allocation2 + $0xc] sm:$0x3] %vm125_vm2, %v116_v36 }
  0x97   :  { %v121_v44 = vrot.slane %v112_v41, 4  ;;  %v124_v45 = vsel %vm73_vm1, 0.0, %v123_v42  ;;  %127 = vst.msk [vmem:[#allocation2 + $0x2] sm:$0x3] %vm125_vm2, %v118_v43 }
  0x98   :  { %130 = vst.msk [vmem:[#allocation2 + $0x8] sm:$0x3] %vm125_vm2, %v112_v41 }
  0x99   :  { %v122_v46 = vsel %vm73_vm1, 0.0, %v121_v44  ;;  %133 = vst.msk [vmem:[#allocation2 + $0xe] sm:$0x3] %vm125_vm2, %v124_v45 }
  0x9a   :  { %131 = vst.msk [vmem:[#allocation2 + $0xa] sm:$0x3] %vm125_vm2, %v122_v46  ;;  %v170_v47 = vpop.f32.mrf.mxu0 }
  0x9b   :  { %v139_v48 = vld [vmem:[#allocation2] sm:$0x3]  ;;  %v285_v47 = vld [vmem:[#allocation2 + $0x4] sm:$0x3] }
  0x9c   :  { %v172_v49 = vadd.f32 %v169_v37, %v139_v48 }
  0x9e   :  { %v1381_v50 = vmul.f32 -1.442695, %v172_v49  ;;  %v218_v15 = vld [vmem:[#allocation2 + $0x2] sm:$0x3] }
  0xa0   :  { %1527 = vpow2.f32 %v1381_v50 }
  0xa6   :  { %v1528_v51 = vpop.eup %1527 }
  0xa7   :  { %v176_v52 = vadd.f32 1.0, %v1528_v51 }
  0xa9   :  { %1529 = vrcp.f32 %v176_v52  ;;  %v188_v58 = vand.u32 2147483648, %v176_v52  ;;  %vm182_vm4 = vweird.f32 %v176_v52  ;;  %v186_v59 = vand.u32 2147483647, %v176_v52 }
  0xab   :  { %v189_v61 = vor.u32 1.1754944e-38, %v188_v58  ;;  %vm187_vm6 = vcmp.eq.f32.partialorder %v186_v59, 8.507059e+37 }
  0xaf   :  { %v1530_v53 = vpop.eup %1529 }
  0xb0   :  { %v178_v54 = vmul.f32 %v1530_v53, %v176_v52  ;;  %vm183_vm3 = vweird.f32 %v1530_v53 }
  0xb1   :  { %vm184_vm5 = vmor %vm182_vm4, %vm183_vm3 }
  0xb2   :  { %v179_v55 = vsub.f32 1.0, %v178_v54 }
  0xb4   :  { %v180_v56 = vmul.f32 %v1530_v53, %v179_v55 }
  0xb6   :  { %v181_v57 = vadd.f32 %v1530_v53, %v180_v56 }
  0xb8   :  { %v185_v60 = vsel %vm184_vm5, %v1530_v53, %v181_v57 }
  0xb9   :  { %v190_v63 = vsel %vm187_vm6, %v189_v61, %v185_v60 }
  0xba   :  { %v203_v4 = vsub.f32 1.0, %v190_v63  ;;  %v209_v6 = vmul.f32 0.0, %v190_v63 }
 0x107   :  { %v194_v62 = vpop.permute.xlu0 %193 }
 0x108   :  { %v196_v0 = vmul.f32 %v194_v62, %v190_v63 }
 0x10a   :  { %198 = vrot.lane.b32.xlu0 %v196_v0, %s1662_s6 }
 0x17c   :  { %v199_v1 = vpop.permute.xlu0 %198 }
 0x17d   :  { %v201_v2 = vadd.f32 %v199_v1, %v139_v48 }
 0x17f   :  { %1531 = vtanh.f32 %v201_v2 }
 0x185   :  { %v1532_v3 = vpop.eup %1531 }
 0x186   :  { %205 = vrot.lane.b32.xlu1 %v1532_v3, %s1663_s21 }
 0x1f8   :  { %v206_v5 = vpop.permute.xlu1 %205 }
 0x1f9   :  { %v208_v7 = vmul.f32 %v206_v5, %v203_v4 }
 0x1fb   :  { %v1779_v8 = vadd.f32 %v209_v6, %v208_v7 }
 0x1fd   :  { %v219_v9 = vpack.c.bf16 %v1779_v8, %v1779_v8 }
 0x1ff   :  { %221 = vrot.lane.b32.xlu1 %v219_v9, %s1663_s21 }
 0x271   :  { %v222_v10 = vpop.permute.xlu1 %221 }
 0x272   :  { %1382 = vmatmul.msk.bf16.vlgmr.msra.gmra.mxu2 %vm155_vm7, %v222_v10 }
 0x2f5   :  { %v235_v12 = vpop.f32.mrf.mxu2 }
 0x2f6   :  { %v236_v13 = vadd.f32 %v1753_v26, %v235_v12 }
 0x2f8   :  { %260 = vrot.lane.b32.xlu2 %v236_v13, %s1662_s6  ;;  %v239_v16 = vadd.f32 %v236_v13, %v218_v15 }
 0x2fa   :  { %v1383_v17 = vmul.f32 -1.442695, %v239_v16 }
 0x2fc   :  { %1533 = vpow2.f32 %v1383_v17 }
 0x2fd   :  { %v237_v14 = vpop.f32.mrf.mxu2 }
 0x302   :  { %v1534_v18 = vpop.eup %1533 }
 0x303   :  { %v243_v20 = vadd.f32 1.0, %v1534_v18 }
 0x305   :  { %1535 = vrcp.f32 %v243_v20  ;;  %v255_v27 = vand.u32 2147483648, %v243_v20  ;;  %vm249_vm9 = vweird.f32 %v243_v20  ;;  %v253_v28 = vand.u32 2147483647, %v243_v20 }
 0x307   :  { %v256_v30 = vor.u32 1.1754944e-38, %v255_v27  ;;  %vm254_vm11 = vcmp.eq.f32.partialorder %v253_v28, 8.507059e+37 }
 0x30b   :  { %v1536_v21 = vpop.eup %1535 }
 0x30c   :  { %v245_v22 = vmul.f32 %v1536_v21, %v243_v20  ;;  %vm250_vm8 = vweird.f32 %v1536_v21 }
 0x30d   :  { %vm251_vm10 = vmor %vm249_vm9, %vm250_vm8 }
 0x30e   :  { %v246_v23 = vsub.f32 1.0, %v245_v22 }
 0x310   :  { %v247_v24 = vmul.f32 %v1536_v21, %v246_v23 }
 0x312   :  { %v248_v25 = vadd.f32 %v1536_v21, %v247_v24 }
 0x314   :  { %v252_v29 = vsel %vm251_vm10, %v1536_v21, %v248_v25 }
 0x315   :  { %v257_v32 = vsel %vm254_vm11, %v256_v30, %v252_v29 }
 0x316   :  { %v270_v37 = vsub.f32 1.0, %v257_v32  ;;  %v276_v39 = vmul.f32 %v257_v32, %v1779_v8 }
 0x352   :  { %v261_v31 = vpop.permute.xlu2 %260 }
 0x353   :  { %v263_v33 = vmul.f32 %v261_v31, %v257_v32 }
 0x355   :  { %265 = vrot.lane.b32.xlu2 %v263_v33, %s1662_s6 }
 0x3af   :  { %v266_v34 = vpop.permute.xlu2 %265 }
 0x3b0   :  { %v268_v35 = vadd.f32 %v266_v34, %v218_v15  ;;  %v352_v15 = vld [vmem:[#allocation2 + $0x6] sm:$0x3] }
 0x3b2   :  { %1537 = vtanh.f32 %v268_v35 }
 0x3b8   :  { %v1538_v36 = vpop.eup %1537 }
 0x3b9   :  { %272 = vrot.lane.b32.xlu0 %v1538_v36, %s1663_s21 }
 0x42b   :  { %v273_v38 = vpop.permute.xlu0 %272 }
 0x42c   :  { %v275_v40 = vmul.f32 %v273_v38, %v270_v37 }
 0x42e   :  { %v1790_v41 = vadd.f32 %v276_v39, %v275_v40 }
 0x430   :  { %v286_v42 = vpack.c.bf16 %v1790_v41, %v1790_v41 }
 0x432   :  { %288 = vrot.lane.b32.xlu1 %v286_v42, %s1663_s21 }
 0x4a4   :  { %v289_v43 = vpop.permute.xlu1 %288 }
 0x4a5   :  { %1384 = vmatmul.msk.bf16.vlgmr.msra.gmra.mxu3 %vm155_vm7, %v289_v43 }
 0x528   :  { %v302_v44 = vpop.f32.mrf.mxu3 }
 0x529   :  { %v303_v45 = vadd.f32 %v1753_v26, %v302_v44 }
 0x52b   :  { %327 = vrot.lane.b32.xlu2 %v303_v45, %s1662_s6  ;;  %v306_v48 = vadd.f32 %v303_v45, %v285_v47 }
 0x52d   :  { %v1385_v49 = vmul.f32 -1.442695, %v306_v48  ;;  %v419_v48 = vld [vmem:[#allocation2 + $0x8] sm:$0x3] }
 0x52f   :  { %1539 = vpow2.f32 %v1385_v49 }
 0x530   :  { %v304_v46 = vpop.f32.mrf.mxu3 }
 0x535   :  { %v1540_v50 = vpop.eup %1539 }
 0x536   :  { %v310_v51 = vadd.f32 1.0, %v1540_v50 }
 0x538   :  { %1541 = vrcp.f32 %v310_v51  ;;  %v322_v57 = vand.u32 2147483648, %v310_v51  ;;  %vm316_vm13 = vweird.f32 %v310_v51  ;;  %v320_v58 = vand.u32 2147483647, %v310_v51 }
 0x53a   :  { %v323_v60 = vor.u32 1.1754944e-38, %v322_v57  ;;  %vm321_vm15 = vcmp.eq.f32.partialorder %v320_v58, 8.507059e+37 }
 0x53e   :  { %v1542_v52 = vpop.eup %1541 }
 0x53f   :  { %v312_v53 = vmul.f32 %v1542_v52, %v310_v51  ;;  %vm317_vm12 = vweird.f32 %v1542_v52 }
 0x540   :  { %vm318_vm14 = vmor %vm316_vm13, %vm317_vm12 }
 0x541   :  { %v313_v54 = vsub.f32 1.0, %v312_v53 }
 0x543   :  { %v314_v55 = vmul.f32 %v1542_v52, %v313_v54 }
 0x545   :  { %v315_v56 = vadd.f32 %v1542_v52, %v314_v55 }
 0x547   :  { %v319_v59 = vsel %vm318_vm14, %v1542_v52, %v315_v56 }
 0x548   :  { %v324_v62 = vsel %vm321_vm15, %v323_v60, %v319_v59 }
 0x549   :  { %v337_v3 = vsub.f32 1.0, %v324_v62  ;;  %v343_v5 = vmul.f32 %v324_v62, %v1790_v41 }
 0x585   :  { %v328_v61 = vpop.permute.xlu2 %327 }
 0x586   :  { %v330_v63 = vmul.f32 %v328_v61, %v324_v62 }
 0x588   :  { %332 = vrot.lane.b32.xlu0 %v330_v63, %s1662_s6 }
 0x5fa   :  { %v333_v0 = vpop.permute.xlu0 %332 }
 0x5fb   :  { %v335_v1 = vadd.f32 %v333_v0, %v285_v47 }
 0x5fd   :  { %1543 = vtanh.f32 %v335_v1 }
 0x603   :  { %v1544_v2 = vpop.eup %1543 }
 0x604   :  { %339 = vrot.lane.b32.xlu1 %v1544_v2, %s1663_s21 }
 0x676   :  { %v340_v4 = vpop.permute.xlu1 %339 }
 0x677   :  { %v342_v6 = vmul.f32 %v340_v4, %v337_v3 }
 0x679   :  { %v1801_v7 = vadd.f32 %v343_v5, %v342_v6 }
 0x67b   :  { %v353_v9 = vpack.c.bf16 %v1801_v7, %v1801_v7 }
 0x67d   :  { %355 = vrot.lane.b32.xlu2 %v353_v9, %s1663_s21 }
 0x6d7   :  { %v356_v10 = vpop.permute.xlu2 %355 }
 0x6d8   :  { %1386 = vmatmul.msk.bf16.vlgmr.msra.gmra.mxu0 %vm155_vm7, %v356_v10 }
 0x755   :  { %v369_v12 = vpop.f32.mrf.mxu0 }
 0x756   :  { %v370_v13 = vadd.f32 %v1753_v26, %v369_v12 }
 0x758   :  { %394 = vrot.lane.b32.xlu0 %v370_v13, %s1662_s6  ;;  %v373_v16 = vadd.f32 %v370_v13, %v352_v15 }
 0x75a   :  { %v1387_v17 = vmul.f32 -1.442695, %v373_v16 }
 0x75c   :  { %1545 = vpow2.f32 %v1387_v17  ;;  %v486_v17 = vld [vmem:[#allocation2 + $0xa] sm:$0x3] }
 0x75d   :  { %v371_v14 = vpop.f32.mrf.mxu0 }
 0x762   :  { %v1546_v18 = vpop.eup %1545 }
 0x763   :  { %v377_v20 = vadd.f32 1.0, %v1546_v18 }
 0x765   :  { %1547 = vrcp.f32 %v377_v20  ;;  %v389_v27 = vand.u32 2147483648, %v377_v20  ;;  %vm383_vm2 = vweird.f32 %v377_v20  ;;  %v387_v28 = vand.u32 2147483647, %v377_v20 }
 0x767   :  { %v390_v30 = vor.u32 1.1754944e-38, %v389_v27  ;;  %vm388_vm4 = vcmp.eq.f32.partialorder %v387_v28, 8.507059e+37 }
 0x76b   :  { %v1548_v21 = vpop.eup %1547 }
 0x76c   :  { %v379_v22 = vmul.f32 %v1548_v21, %v377_v20  ;;  %vm384_vm0 = vweird.f32 %v1548_v21 }
 0x76d   :  { %vm385_vm3 = vmor %vm383_vm2, %vm384_vm0 }
 0x76e   :  { %v380_v23 = vsub.f32 1.0, %v379_v22 }
 0x770   :  { %v381_v24 = vmul.f32 %v1548_v21, %v380_v23 }
 0x772   :  { %v382_v25 = vadd.f32 %v1548_v21, %v381_v24 }
 0x774   :  { %v386_v29 = vsel %vm385_vm3, %v1548_v21, %v382_v25 }
 0x775   :  { %v391_v32 = vsel %vm388_vm4, %v390_v30, %v386_v29 }
 0x776   :  { %v404_v37 = vsub.f32 1.0, %v391_v32  ;;  %v410_v39 = vmul.f32 %v391_v32, %v1801_v7 }
 0x7ca   :  { %v395_v31 = vpop.permute.xlu0 %394 }
 0x7cb   :  { %v397_v33 = vmul.f32 %v395_v31, %v391_v32 }
 0x7cd   :  { %399 = vrot.lane.b32.xlu1 %v397_v33, %s1662_s6 }
 0x83f   :  { %v400_v34 = vpop.permute.xlu1 %399 }
 0x840   :  { %v402_v35 = vadd.f32 %v400_v34, %v352_v15 }
 0x842   :  { %1549 = vtanh.f32 %v402_v35 }
 0x848   :  { %v1550_v36 = vpop.eup %1549 }
 0x849   :  { %406 = vrot.lane.b32.xlu2 %v1550_v36, %s1663_s21 }
 0x8a3   :  { %v407_v38 = vpop.permute.xlu2 %406 }
 0x8a4   :  { %v409_v40 = vmul.f32 %v407_v38, %v404_v37 }
 0x8a6   :  { %v1812_v42 = vadd.f32 %v410_v39, %v409_v40 }
 0x8a8   :  { %v420_v43 = vpack.c.bf16 %v1812_v42, %v1812_v42 }
 0x8aa   :  { %422 = vrot.lane.b32.xlu0 %v420_v43, %s1663_s21 }
 0x91c   :  { %v423_v44 = vpop.permute.xlu0 %422 }
 0x91d   :  { %1388 = vmatmul.msk.bf16.vlgmr.msra.gmra.mxu1 %vm155_vm7, %v423_v44 }
 0x99a   :  { %v436_v45 = vpop.f32.mrf.mxu1 }
 0x99b   :  { %v437_v46 = vadd.f32 %v1753_v26, %v436_v45 }
 0x99d   :  { %461 = vrot.lane.b32.xlu1 %v437_v46, %s1662_s6  ;;  %v440_v49 = vadd.f32 %v437_v46, %v419_v48 }
 0x99f   :  { %v1389_v50 = vmul.f32 -1.442695, %v440_v49 }
 0x9a1   :  { %1551 = vpow2.f32 %v1389_v50 }
 0x9a2   :  { %v438_v47 = vpop.f32.mrf.mxu1 }
 0x9a7   :  { %v1552_v51 = vpop.eup %1551 }
 0x9a8   :  { %v444_v52 = vadd.f32 1.0, %v1552_v51  ;;  %v553_v51 = vld [vmem:[#allocation2 + $0xc] sm:$0x3] }
 0x9aa   :  { %1553 = vrcp.f32 %v444_v52  ;;  %v456_v58 = vand.u32 2147483648, %v444_v52  ;;  %vm450_vm6 = vweird.f32 %v444_v52  ;;  %v454_v59 = vand.u32 2147483647, %v444_v52 }
 0x9ac   :  { %v457_v61 = vor.u32 1.1754944e-38, %v456_v58  ;;  %vm455_vm9 = vcmp.eq.f32.partialorder %v454_v59, 8.507059e+37 }
 0x9b0   :  { %v1554_v53 = vpop.eup %1553 }
 0x9b1   :  { %v446_v54 = vmul.f32 %v1554_v53, %v444_v52  ;;  %vm451_vm5 = vweird.f32 %v1554_v53 }
 0x9b2   :  { %vm452_vm8 = vmor %vm450_vm6, %vm451_vm5 }
 0x9b3   :  { %v447_v55 = vsub.f32 1.0, %v446_v54 }
 0x9b5   :  { %v448_v56 = vmul.f32 %v1554_v53, %v447_v55 }
 0x9b7   :  { %v449_v57 = vadd.f32 %v1554_v53, %v448_v56 }
 0x9b9   :  { %v453_v60 = vsel %vm452_vm8, %v1554_v53, %v449_v57  ;;  %vm215_vm8 = vcmask 254976  }
 0x9ba   :  { %v458_v63 = vsel %vm455_vm9, %v457_v61, %v453_v60 }
 0x9bb   :  { %v471_v4 = vsub.f32 1.0, %v458_v63  ;;  %v477_v6 = vmul.f32 %v458_v63, %v1812_v42 }
 0xa0f   :  { %v462_v62 = vpop.permute.xlu1 %461 }
 0xa10   :  { %v464_v0 = vmul.f32 %v462_v62, %v458_v63 }
 0xa12   :  { %466 = vrot.lane.b32.xlu2 %v464_v0, %s1662_s6 }
 0xa6c   :  { %v467_v1 = vpop.permute.xlu2 %466 }
 0xa6d   :  { %v469_v2 = vadd.f32 %v467_v1, %v419_v48 }
 0xa6f   :  { %1555 = vtanh.f32 %v469_v2 }
 0xa75   :  { %v1556_v3 = vpop.eup %1555 }
 0xa76   :  { %473 = vrot.lane.b32.xlu0 %v1556_v3, %s1663_s21 }
 0xae8   :  { %v474_v5 = vpop.permute.xlu0 %473 }
 0xae9   :  { %v476_v9 = vmul.f32 %v474_v5, %v471_v4 }
 0xaeb   :  { %v1823_v10 = vadd.f32 %v477_v6, %v476_v9 }
 0xaed   :  { %v487_v12 = vpack.c.bf16 %v1823_v10, %v1823_v10 }
 0xaef   :  { %489 = vrot.lane.b32.xlu1 %v487_v12, %s1663_s21 }
 0xb61   :  { %v490_v13 = vpop.permute.xlu1 %489 }
 0xb62   :  { %1390 = vmatmul.msk.bf16.vlgmr.msrb.gmra.mxu2 %vm155_vm7, %v490_v13 }
 0xbe5   :  { %v503_v14 = vpop.f32.mrf.mxu2 }
 0xbe6   :  { %v504_v15 = vadd.f32 %v1753_v26, %v503_v14 }
 0xbe8   :  { %528 = vrot.lane.b32.xlu2 %v504_v15, %s1662_s6  ;;  %v507_v18 = vadd.f32 %v504_v15, %v486_v17 }
 0xbea   :  { %v1391_v20 = vmul.f32 -1.442695, %v507_v18  ;;  %v1507_v18 = vld [vmem:[%s2079_s7 + $0x8] sm:$0xff] }
 0xbeb   :  { %917 = vmatpush.bf16.msrb.mxu1 %v1507_v18  ;;  %1509 = vmatpush.bf16.msra.mxu3 %v1507_v18 }
 0xbec   :  { %1557 = vpow2.f32 %v1391_v20  ;;  %v1506_v20 = vld [vmem:[%s2079_s7] sm:$0xff]  ;;  %1508 = vmatpush.bf16.msra.mxu2 %v1507_v18 }
 0xbed   :  { %v505_v16 = vpop.f32.mrf.mxu2 }
 0xbef   :  { %918 = vmatpush.bf16.msrb.mxu1 %v1506_v20  ;;  %1511 = vmatpush.bf16.msra.mxu3 %v1506_v20 }
 0xbf0   :  { %1510 = vmatpush.bf16.msra.mxu2 %v1506_v20 }
 0xbf2   :  { %v1558_v21 = vpop.eup %1557 }
 0xbf3   :  { %v511_v22 = vadd.f32 1.0, %v1558_v21  ;;  %v1860_v21 = vld [vmem:[%s2074_s2] sm:$0xff] }
 0xbf4   :  { %1468 = vmatmul.msk.bf16.vlgmr.msrb.gmra.mxu1 %vm155_vm7, %v1860_v21 }
 0xbf5   :  { %1559 = vrcp.f32 %v511_v22  ;;  %v523_v29 = vand.u32 2147483648, %v511_v22  ;;  %vm517_vm11 = vweird.f32 %v511_v22  ;;  %v521_v30 = vand.u32 2147483647, %v511_v22 }
 0xbf7   :  { %v524_v32 = vor.u32 1.1754944e-38, %v523_v29  ;;  %vm522_vm13 = vcmp.eq.f32.partialorder %v521_v30, 8.507059e+37  ;;  %v1494_v29 = vld [vmem:[%s2074_s2 + $0x20] sm:$0xff]  ;;  %v1891_v30 = vld [vmem:[#allocation2 + $0xe] sm:$0x3] }
 0xbfb   :  { %v1560_v23 = vpop.eup %1559 }
 0xbfc   :  { %v513_v24 = vmul.f32 %v1560_v23, %v511_v22  ;;  %vm518_vm10 = vweird.f32 %v1560_v23 }
 0xbfd   :  { %vm519_vm12 = vmor %vm517_vm11, %vm518_vm10 }
 0xbfe   :  { %v514_v25 = vsub.f32 1.0, %v513_v24  ;;  %v1491_v24 = vld [vmem:[%s2074_s2 + $0x8] sm:$0xff] }
 0xc00   :  { %v515_v27 = vmul.f32 %v1560_v23, %v514_v25 }
 0xc02   :  { %v516_v28 = vadd.f32 %v1560_v23, %v515_v27  ;;  %v1492_v27 = vld [vmem:[%s2074_s2 + $0x10] sm:$0xff] }
 0xc04   :  { %v520_v31 = vsel %vm519_vm12, %v1560_v23, %v516_v28  ;;  %1469 = vmatmul.msk.bf16.gmra.mxu1 %vm155_vm7, %v1491_v24  ;;  %v1493_v28 = vld [vmem:[%s2074_s2 + $0x18] sm:$0xff] }
 0xc05   :  { %v525_v34 = vsel %vm522_vm13, %v524_v32, %v520_v31  ;;  %v1495_v32 = vld [vmem:[%s2074_s2 + $0x28] sm:$0xff] }
 0xc06   :  { %v538_v39 = vsub.f32 1.0, %v525_v34  ;;  %v544_v43 = vmul.f32 %v525_v34, %v1823_v10 }
 0xc14   :  { %1470 = vmatmul.msk.bf16.gmra.mxu1 %vm155_vm7, %v1492_v27 }
 0xc24   :  { %1471 = vmatmul.msk.bf16.gmra.mxu1 %vm155_vm7, %v1493_v28 }
 0xc34   :  { %1472 = vmatmul.msk.bf16.gmra.mxu1 %vm155_vm7, %v1494_v29 }
 0xc42   :  { %v529_v33 = vpop.permute.xlu2 %528 }
 0xc43   :  { %v531_v35 = vmul.f32 %v529_v33, %v525_v34 }
 0xc44   :  { %1473 = vmatmul.msk.bf16.gmra.mxu1 %vm155_vm7, %v1495_v32 }
 0xc45   :  { %533 = vrot.lane.b32.xlu0 %v531_v35, %s1662_s6 }
 0xcb7   :  { %v534_v36 = vpop.permute.xlu0 %533 }
 0xcb8   :  { %v536_v37 = vadd.f32 %v534_v36, %v486_v17  ;;  %v1497_v36 = vld [vmem:[%s2074_s2 + $0x38] sm:$0xff] }
 0xcb9   :  { %1475 = vmatmul.msk.bf16.vlgmr.msra.gmra.mxu2 %vm155_vm7, %v1497_v36  ;;  %1264 = vmatpush.bf16.msra.mxu0 %v1497_v36 }
 0xcba   :  { %1561 = vtanh.f32 %v536_v37  ;;  %v1502_v37 = vld [vmem:[%s2074_s2 + $0x60] sm:$0xff] }
 0xcc0   :  { %v1562_v38 = vpop.eup %1561 }
 0xcc1   :  { %540 = vrot.lane.b32.xlu1 %v1562_v38, %s1663_s21 }
 0xd33   :  { %v541_v40 = vpop.permute.xlu1 %540 }
 0xd34   :  { %v543_v44 = vmul.f32 %v541_v40, %v538_v39  ;;  %v1496_v39 = vld [vmem:[%s2074_s2 + $0x30] sm:$0xff] }
 0xd35   :  { %1474 = vmatmul.msk.bf16.gmra.mxu1 %vm155_vm7, %v1496_v39  ;;  %1265 = vmatpush.bf16.msra.mxu0 %v1496_v39 }
 0xd36   :  { %v1834_v45 = vadd.f32 %v544_v43, %v543_v44  ;;  %v1503_v43 = vld [vmem:[%s2074_s2 + $0x68] sm:$0xff] }
 0xd38   :  { %v554_v46 = vpack.c.bf16 %v1834_v45, %v1834_v45 }
 0xd39   :  { %1266 = vmatpush.bf16.msra.mxu0 %v1495_v32  ;;  %v1500_v32 = vld [vmem:[%s2074_s2 + $0x50] sm:$0xff] }
 0xd3a   :  { %556 = vrot.lane.b32.xlu2 %v554_v46, %s1663_s21 }
 0xd3d   :  { %1267 = vmatpush.bf16.msra.mxu0 %v1494_v29 }
 0xd41   :  { %1268 = vmatpush.bf16.msra.mxu0 %v1493_v28 }
 0xd45   :  { %1269 = vmatpush.bf16.msra.mxu0 %v1492_v27  ;;  %v1498_v27 = vld [vmem:[%s2074_s2 + $0x40] sm:$0xff] }
 0xd46   :  { %1476 = vmatmul.msk.bf16.gmra.mxu2 %vm155_vm7, %v1498_v27 }
 0xd49   :  { %1270 = vmatpush.bf16.msra.mxu0 %v1491_v24 }
 0xd4d   :  { %1271 = vmatpush.bf16.msra.mxu0 %v1860_v21 }
 0xd94   :  { %v557_v47 = vpop.permute.xlu2 %556 }
 0xd95   :  { %1392 = vmatmul.msk.bf16.vlgmr.msrb.gmra.mxu3 %vm155_vm7, %v557_v47 }
 0xe18   :  { %v570_v48 = vpop.f32.mrf.mxu3 }
 0xe19   :  { %v571_v49 = vadd.f32 %v1753_v26, %v570_v48 }
 0xe1b   :  { %595 = vrot.lane.b32.xlu0 %v571_v49, %s1662_s6  ;;  %v574_v52 = vadd.f32 %v571_v49, %v553_v51 }
 0xe1d   :  { %v1393_v53 = vmul.f32 -1.442695, %v574_v52  ;;  %v1504_v52 = vld [vmem:[%s2074_s2 + $0x70] sm:$0xff] }
 0xe1f   :  { %1563 = vpow2.f32 %v1393_v53 }
 0xe20   :  { %v572_v50 = vpop.f32.mrf.mxu3 }
 0xe25   :  { %v1564_v54 = vpop.eup %1563 }
 0xe26   :  { %v578_v55 = vadd.f32 1.0, %v1564_v54 }
 0xe28   :  { %1565 = vrcp.f32 %v578_v55  ;;  %v590_v61 = vand.u32 2147483648, %v578_v55  ;;  %vm584_vm15 = vweird.f32 %v578_v55  ;;  %v588_v62 = vand.u32 2147483647, %v578_v55 }
 0xe2a   :  { %v591_v0 = vor.u32 1.1754944e-38, %v590_v61  ;;  %vm589_vm2 = vcmp.eq.f32.partialorder %v588_v62, 8.507059e+37 }
 0xe2e   :  { %v1566_v56 = vpop.eup %1565 }
 0xe2f   :  { %v580_v57 = vmul.f32 %v1566_v56, %v578_v55  ;;  %vm585_vm14 = vweird.f32 %v1566_v56 }
 0xe30   :  { %vm586_vm0 = vmor %vm584_vm15, %vm585_vm14 }
 0xe31   :  { %v581_v58 = vsub.f32 1.0, %v580_v57  ;;  %v1505_v57 = vld [vmem:[%s2074_s2 + $0x78] sm:$0xff] }
 0xe33   :  { %v582_v59 = vmul.f32 %v1566_v56, %v581_v58 }
 0xe35   :  { %v583_v60 = vadd.f32 %v1566_v56, %v582_v59 }
 0xe37   :  { %v587_v63 = vsel %vm586_vm0, %v1566_v56, %v583_v60  ;;  %v920_v56 = vpop.f32.mrf.mxu1 }
 0xe38   :  { %v592_v2 = vsel %vm589_vm2, %v591_v0, %v587_v63  ;;  %v1000_v58 = vpack.c.bf16 %v920_v56, %v920_v56 }
 0xe39   :  { %v605_v9 = vsub.f32 1.0, %v592_v2  ;;  %v611_v13 = vmul.f32 %v592_v2, %v1834_v45 }
 0xe3a   :  { %v1927_v61 = vunpack.c.l.b16 %v1000_v58 }
 0xe3f   :  { %v922_v60 = vpop.f32.mrf.mxu1 }
 0xe40   :  { %v1001_v62 = vpack.c.bf16 %v922_v60, %v922_v60 }
 0xe42   :  { %v1931_v63 = vunpack.c.l.b16 %v1001_v62 }
 0xe44   :  { %v1066_v0 = vpack.c.b16 %v1931_v63, %v1927_v61 }
 0xe8d   :  { %v596_v1 = vpop.permute.xlu0 %595 }
 0xe8e   :  { %v598_v3 = vmul.f32 %v596_v1, %v592_v2  ;;  %v925_v1 = vpop.f32.mrf.mxu1 }
 0xe8f   :  { %v1002_v2 = vpack.c.bf16 %v925_v1, %v925_v1 }
 0xe90   :  { %600 = vrot.lane.b32.xlu1 %v598_v3, %s1662_s6 }
 0xe96   :  { %v927_v3 = vpop.f32.mrf.mxu1 }
 0xf02   :  { %v601_v4 = vpop.permute.xlu1 %600 }
 0xf03   :  { %v603_v5 = vadd.f32 %v601_v4, %v553_v51  ;;  %v1939_v4 = vunpack.c.l.b16 %v1002_v2 }
 0xf05   :  { %1567 = vtanh.f32 %v603_v5 }
 0xf0b   :  { %v1568_v6 = vpop.eup %1567 }
 0xf0c   :  { %607 = vrot.lane.b32.xlu2 %v1568_v6, %s1663_s21 }
 0xf66   :  { %v608_v12 = vpop.permute.xlu2 %607 }
 0xf67   :  { %v610_v14 = vmul.f32 %v608_v12, %v605_v9  ;;  %v930_v9 = vpop.f32.mrf.mxu1 }
 0xf68   :  { %v1004_v12 = vpack.c.bf16 %v930_v9, %v930_v9 }
 0xf69   :  { %v1845_v15 = vadd.f32 %v611_v13, %v610_v14 }
 0xf6a   :  { %v1947_v13 = vunpack.c.l.b16 %v1004_v12 }
 0xf6b   :  { %v621_v16 = vpack.c.bf16 %v1845_v15, %v1845_v15 }
 0xf6d   :  { %623 = vrot.lane.b32.xlu0 %v621_v16, %s1663_s21 }
 0xfdf   :  { %v624_v17 = vpop.permute.xlu0 %623 }
 0xfe0   :  { %1394 = vmatmul.msk.bf16.vlgmr.msrb.gmra.mxu0 %vm155_vm7, %v624_v17 }
 0xfe1   :  { %1285 = vmatpush.bf16.msrb.mxu0 %v1505_v57 }
 0xfe5   :  { %1286 = vmatpush.bf16.msrb.mxu0 %v1504_v52 }
 0xfe9   :  { %1287 = vmatpush.bf16.msrb.mxu0 %v1503_v43 }
 0xfed   :  { %1288 = vmatpush.bf16.msrb.mxu0 %v1502_v37 }
0x105d   :  { %v637_v22 = vpop.f32.mrf.mxu0 }
0x105e   :  { %v638_v23 = vadd.f32 %v1753_v26, %v637_v22  ;;  %v1879_v26 = vld [vmem:[%s2074_s2 + $0x58] sm:$0xff] }
0x105f   :  { %1479 = vmatmul.msk.bf16.vlgmr.msra.gmra.mxu3 %vm155_vm7, %v1879_v26  ;;  %1289 = vmatpush.bf16.msrb.mxu0 %v1879_v26 }
0x1060   :  { %662 = vrot.lane.b32.xlu1 %v638_v23, %s1662_s6  ;;  %v641_v31 = vadd.f32 %v638_v23, %v1891_v30 }
0x1062   :  { %v1395_v33 = vmul.f32 -1.442695, %v641_v31 }
0x1063   :  { %1290 = vmatpush.bf16.msrb.mxu0 %v1500_v32 }
0x1064   :  { %1569 = vpow2.f32 %v1395_v33 }
0x1065   :  { %v639_v25 = vpop.f32.mrf.mxu0 }
0x1068   :  { %614 = vrot.lane.b32.xlu1 %v1845_v15, %s1663_s21 }
0x106a   :  { %v1570_v34 = vpop.eup %1569 }
0x106b   :  { %v645_v35 = vadd.f32 1.0, %v1570_v34 }
0x106d   :  { %1571 = vrcp.f32 %v645_v35  ;;  %v657_v48 = vand.u32 2147483648, %v645_v35  ;;  %vm651_vm4 = vweird.f32 %v645_v35  ;;  %v655_v49 = vand.u32 2147483647, %v645_v35 }
0x106f   :  { %1480 = vmatmul.msk.bf16.gmra.mxu3 %vm155_vm7, %v1502_v37  ;;  %v658_v51 = vor.u32 1.1754944e-38, %v657_v48  ;;  %vm656_vm6 = vcmp.eq.f32.partialorder %v655_v49, 8.507059e+37  ;;  %v1499_v37 = vld [vmem:[%s2074_s2 + $0x48] sm:$0xff] }
0x1070   :  { %1291 = vmatpush.bf16.msrb.mxu0 %v1499_v37  ;;  %1477 = vmatmul.msk.bf16.gmra.mxu2 %vm155_vm7, %v1499_v37 }
0x1073   :  { %v1572_v38 = vpop.eup %1571 }
0x1074   :  { %v647_v40 = vmul.f32 %v1572_v38, %v645_v35  ;;  %vm652_vm3 = vweird.f32 %v1572_v38  ;;  %1292 = vmatpush.bf16.msrb.mxu0 %v1498_v27 }
0x1075   :  { %vm653_vm5 = vmor %vm651_vm4, %vm652_vm3  ;;  %vm1310_vm3 = vcmask 523520  }
0x1076   :  { %v648_v44 = vsub.f32 1.0, %v647_v40 }
0x1078   :  { %v649_v46 = vmul.f32 %v1572_v38, %v648_v44 }
0x107a   :  { %v650_v47 = vadd.f32 %v1572_v38, %v649_v46 }
0x107c   :  { %v654_v50 = vsel %vm653_vm5, %v1572_v38, %v650_v47  ;;  %v955_v47 = vpop.f32.mrf.mxu2 }
0x107d   :  { %v1917_v54 = vsel %vm656_vm6, %v658_v51, %v654_v50  ;;  %v1014_v49 = vpack.c.bf16 %v955_v47, %v955_v47 }
0x107e   :  { %v672_v63 = vsub.f32 1.0, %v1917_v54 }
0x107f   :  { %1481 = vmatmul.msk.bf16.gmra.mxu3 %vm155_vm7, %v1503_v43 }
0x1080   :  { %1478 = vmatmul.msk.bf16.gmra.mxu2 %vm155_vm7, %v1500_v32 }
0x108f   :  { %1482 = vmatmul.msk.bf16.gmra.mxu3 %vm155_vm7, %v1504_v52 }
0x109f   :  { %1483 = vmatmul.msk.bf16.gmra.mxu3 %vm155_vm7, %v1505_v57 }
0x10d2   :  { %v663_v53 = vpop.permute.xlu1 %662 }
0x10d3   :  { %v665_v55 = vmul.f32 %v663_v53, %v1917_v54  ;;  %v957_v53 = vpop.f32.mrf.mxu2 }
0x10d4   :  { %v1015_v58 = vpack.c.bf16 %v957_v53, %v957_v53 }
0x10d5   :  { %667 = vrot.lane.b32.xlu2 %v665_v55, %s1662_s6 }
0x10d6   :  { %v1065_v60 = vunpack.c.l.b16 %v1015_v58  ;;  %v1078_v58 = vsel %vm155_vm7, %v1066_v0, 0 }
0x10da   :  { %v615_v59 = vpop.permute.xlu1 %614 }
0x10db   :  { %618 = vst.msk [vmem:[#allocation3 + $0xc] sm:$0x3] %vm215_vm8, %v615_v59  ;;  %v960_v61 = vpop.f32.mrf.mxu2 }
0x10dd   :  { %413 = vrot.lane.b32.xlu2 %v1812_v42, %s1663_s21  ;;  %v1003_v42 = vpack.c.bf16 %v927_v3, %v927_v3 }
0x10df   :  { %v1943_v5 = vunpack.c.l.b16 %v1003_v42 }
0x10e1   :  { %v1067_v6 = vpack.c.b16 %v1943_v5, %v1939_v4 }
0x10e2   :  { %v975_v26 = vpop.f32.mrf.mxu3 }
0x10e3   :  { %v1022_v29 = vpack.c.bf16 %v975_v26, %v975_v26 }
0x10e5   :  { %279 = vrot.lane.b32.xlu2 %v1790_v41, %s1663_s21  ;;  %v932_v41 = vpop.f32.mrf.mxu1  ;;  %v1970_v33 = vunpack.c.l.b16 %v1022_v29 }
0x10e6   :  { %v1005_v14 = vpack.c.bf16 %v932_v41, %v932_v41 }
0x10e8   :  { %v1949_v16 = vunpack.c.l.b16 %v1005_v14 }
0x10ea   :  { %v1068_v17 = vpack.c.b16 %v1949_v16, %v1947_v13  ;;  %v977_v31 = vpop.f32.mrf.mxu3 }
0x10eb   :  { %v1023_v35 = vpack.c.bf16 %v977_v31, %v977_v31 }
0x10ec   :  { %v1084_v47 = vsel %vm155_vm7, %v1068_v17, 0 }
0x10ed   :  { %212 = vrot.lane.b32.xlu2 %v1779_v8, %s1663_s21  ;;  %v935_v18 = vpop.f32.mrf.mxu1  ;;  %v1972_v36 = vunpack.c.l.b16 %v1023_v35 }
0x10ee   :  { %v1006_v20 = vpack.c.bf16 %v935_v18, %v935_v18 }
0x10ef   :  { %v1149_v38 = vpack.c.b16 %v1972_v36, %v1970_v33 }
0x10f0   :  { %v1953_v8 = vunpack.c.l.b16 %v1006_v20 }
0x10f2   :  { %v980_v48 = vpop.f32.mrf.mxu3 }
0x10f3   :  { %v1024_v51 = vpack.c.bf16 %v980_v48, %v980_v48 }
0x10f5   :  { %v937_v21 = vpop.f32.mrf.mxu1  ;;  %v1986_v56 = vunpack.c.l.b16 %v1024_v51 }
0x10f6   :  { %v1007_v22 = vpack.c.bf16 %v937_v21, %v937_v21 }
0x10f8   :  { %v1955_v23 = vunpack.c.l.b16 %v1007_v22 }
0x10fa   :  { %v1069_v24 = vpack.c.b16 %v1955_v23, %v1953_v8  ;;  %v982_v55 = vpop.f32.mrf.mxu3  ;;  %v1081_v23 = vsel %vm155_vm7, %v1067_v6, 0 }
0x10fb   :  { %v1025_v59 = vpack.c.bf16 %v982_v55, %v982_v55 }
0x10fd   :  { %v1959_v25 = vpop.f32.mrf.mxu1  ;;  %v1988_v62 = vunpack.c.l.b16 %v1025_v59 }
0x10fe   :  { %v1008_v31 = vpack.c.bf16 %v1959_v25, %v1959_v25  ;;  %v1087_v25 = vsel %vm155_vm7, %v1069_v24, 0 }
0x10ff   :  { %v1150_v42 = vpack.c.b16 %v1988_v62, %v1986_v56  ;;  %v678_v62 = vmul.f32 %v1917_v54, %v1845_v15 }
0x1100   :  { %v1058_v37 = vunpack.c.l.b16 %v1008_v31 }
0x1101   :  { %v1170_v6 = vsel %vm155_vm7, %v1150_v42, 0 }
0x1102   :  { %v985_v14 = vpop.f32.mrf.mxu3 }
0x1103   :  { %v1026_v13 = vpack.c.bf16 %v985_v14, %v985_v14 }
0x1105   :  { %v1964_v28 = vpop.f32.mrf.mxu1  ;;  %v1140_v56 = vunpack.c.l.b16 %v1026_v13  ;;  %v693_v13 = vld [vmem:[#allocation3 + $0xc] sm:$0x3] }
0x1106   :  { %v1009_v32 = vpack.c.bf16 %v1964_v28, %v1964_v28 }
0x110a   :  { %v987_v29 = vpop.f32.mrf.mxu3 }
0x110b   :  { %v1027_v16 = vpack.c.bf16 %v987_v29, %v987_v29 }
0x110d   :  { %v945_v34 = vpop.f32.mrf.mxu1 }
0x110e   :  { %v1010_v18 = vpack.c.bf16 %v945_v34, %v945_v34 }
0x1110   :  { %v1060_v22 = vunpack.c.l.b16 %v1010_v18 }
0x1112   :  { %v990_v34 = vpop.f32.mrf.mxu3 }
0x1115   :  { %v947_v43 = vpop.f32.mrf.mxu1 }
0x1116   :  { %v1011_v20 = vpack.c.bf16 %v947_v43, %v947_v43 }
0x1118   :  { %v1061_v27 = vunpack.c.l.b16 %v1011_v20 }
0x111a   :  { %v1071_v35 = vpack.c.b16 %v1061_v27, %v1060_v22 }
0x111d   :  { %v950_v50 = vpop.f32.mrf.mxu1 }
0x111e   :  { %v1012_v57 = vpack.c.bf16 %v950_v50, %v950_v50 }
0x1120   :  { %v1062_v2 = vunpack.c.l.b16 %v1012_v57  ;;  %v1141_v57 = vunpack.c.l.b16 %v1027_v16 }
0x1122   :  { %v1151_v4 = vpack.c.b16 %v1141_v57, %v1140_v56  ;;  %v707_v57 = vrot.slane %v693_v13, 4 }
0x1124   :  { %v1173_v5 = vsel %vm155_vm7, %v1151_v4, 0 }
0x1125   :  { %v952_v1 = vpop.f32.mrf.mxu1 }
0x1126   :  { %v1013_v9 = vpack.c.bf16 %v952_v1, %v952_v1 }
0x1128   :  { %v1063_v41 = vunpack.c.l.b16 %v1013_v9 }
0x112a   :  { %v1072_v21 = vpack.c.b16 %v1063_v41, %v1062_v2 }
0x112c   :  { %v1096_v26 = vsel %vm155_vm7, %v1072_v21, 0 }
0x112f   :  { %v668_v39 = vpop.permute.xlu2 %667 }
0x1130   :  { %v670_v40 = vadd.f32 %v668_v39, %v1891_v30  ;;  %v1064_v30 = vunpack.c.l.b16 %v1014_v49  ;;  %v1059_v39 = vunpack.c.l.b16 %v1009_v32  ;;  %v1028_v49 = vpack.c.bf16 %v990_v34, %v990_v34 }
0x1132   :  { %1573 = vtanh.f32 %v670_v40  ;;  %v1073_v3 = vpack.c.b16 %v1065_v60, %v1064_v30  ;;  %v1070_v40 = vpack.c.b16 %v1059_v39, %v1058_v37  ;;  %v1142_v53 = vunpack.c.l.b16 %v1028_v49 }
0x1133   :  { %v1167_v60 = vsel %vm155_vm7, %v1149_v38, 0 }
0x1134   :  { %v1090_v43 = vsel %vm155_vm7, %v1070_v40, 0 }
0x1137   :  { %v414_v44 = vpop.permute.xlu2 %413 }
0x1138   :  { %v1574_v46 = vpop.eup %1573  ;;  %417 = vst.msk [vmem:[#allocation3 + $0x6] sm:$0x3] %vm215_vm8, %v414_v44  ;;  %v992_v44 = vpop.f32.mrf.mxu3 }
0x1139   :  { %674 = vrot.lane.b32.xlu0 %v1574_v46, %s1663_s21  ;;  %v1029_v50 = vpack.c.bf16 %v992_v44, %v992_v44 }
0x113b   :  { %v1143_v55 = vunpack.c.l.b16 %v1029_v50 }
0x113d   :  { %v1152_v17 = vpack.c.b16 %v1143_v55, %v1142_v53 }
0x113f   :  { %v280_v52 = vpop.permute.xlu2 %279  ;;  %v1176_v59 = vsel %vm155_vm7, %v1152_v17, 0 }
0x1140   :  { %283 = vst.msk [vmem:[#allocation3 + $0x2] sm:$0x3] %vm215_vm8, %v280_v52  ;;  %v995_v46 = vpop.f32.mrf.mxu3 }
0x1141   :  { %547 = vrot.lane.b32.xlu0 %v1834_v45, %s1663_s21  ;;  %v1099_v45 = vsel %vm155_vm7, %v1073_v3, 0  ;;  %v1030_v28 = vpack.c.bf16 %v995_v46, %v995_v46  ;;  %v962_v3 = vpop.f32.mrf.mxu2  ;;  %v690_v46 = vld [vmem:[#allocation3 + $0x6] sm:$0x3] }
0x1142   :  { %1101 = vmatpush.bf16.xpose.msrb.mxu2 %v1099_v45 }
0x1143   :  { %v1144_v51 = vunpack.c.l.b16 %v1030_v28 }
0x1147   :  { %v213_v12 = vpop.permute.xlu2 %212  ;;  %v688_v28 = vld [vmem:[#allocation3 + $0x2] sm:$0x3] }
0x1148   :  { %216 = vst.msk [vmem:[#allocation3] sm:$0x3] %vm215_vm8, %v213_v12  ;;  %v997_v48 = vpop.f32.mrf.mxu3 }
0x1149   :  { %346 = vrot.lane.b32.xlu0 %v1801_v7, %s1663_s21  ;;  %v1093_v7 = vsel %vm155_vm7, %v1071_v35, 0  ;;  %v1031_v52 = vpack.c.bf16 %v997_v48, %v997_v48  ;;  %v965_v9 = vpop.f32.mrf.mxu2  ;;  %v701_v48 = vrot.slane %v690_v46, 4 }
0x114a   :  { %1102 = vmatpush.bf16.xpose.msrb.mxu2 %v1096_v26  ;;  %v1018_v15 = vpack.c.bf16 %v965_v9, %v965_v9  ;;  %v1016_v26 = vpack.c.bf16 %v960_v61, %v960_v61 }
0x114b   :  { %v1145_v30 = vunpack.c.l.b16 %v1031_v52  ;;  %v702_v49 = vsel %vm73_vm1, %v701_v48, %v688_v28 }
0x114c   :  { %v1132_v20 = vunpack.c.l.b16 %v1018_v15  ;;  %v1130_v31 = vunpack.c.l.b16 %v1016_v26  ;;  %v706_v53 = vperm.slane %v702_v49, %v1740_v11 }
0x114d   :  { %v1153_v8 = vpack.c.b16 %v1145_v30, %v1144_v51 }
0x114e   :  { %v719_v16 = vrot.slane %v706_v53, 4 }
0x114f   :  { %v1179_v24 = vsel %vm155_vm7, %v1153_v8, 0  ;;  %v687_v50 = vld [vmem:[#allocation3] sm:$0x3] }
0x1150   :  { %1181 = vmatpush.bf16.xpose.msrb.mxu3 %v1179_v24 }
0x1151   :  { %v967_v36 = vpop.f32.mrf.mxu2 }
0x1152   :  { %1103 = vmatpush.bf16.xpose.msrb.mxu2 %v1093_v7  ;;  %v1019_v54 = vpack.c.bf16 %v967_v36, %v967_v36  ;;  %v1194_v7 = vld [vmem:[%s2072_s0] sm:$0x3]  ;;  %s1664_s0 = smov 32  }
0x1153   :  { %v1195_v34 = vrot.slane %v1194_v7, 1  ;;  %v1198_v40 = vperm.slane %v1194_v7, 0 }
0x1154   :  { %v1133_v21 = vunpack.c.l.b16 %v1019_v54 }
0x1155   :  { %1201 = vperm.xlu0 %1523, %v1198_v40  }
0x1156   :  { %v1147_v29 = vpack.c.b16 %v1133_v21, %v1132_v20 }
0x1158   :  { %1182 = vmatpush.bf16.xpose.msrb.mxu3 %v1176_v59  ;;  %v1161_v35 = vsel %vm155_vm7, %v1147_v29, 0 }
0x1159   :  { %v970_v38 = vpop.f32.mrf.mxu2 }
0x115a   :  { %1104 = vmatpush.bf16.xpose.msrb.mxu2 %v1090_v43  ;;  %v1020_v12 = vpack.c.bf16 %v970_v38, %v970_v38  ;;  %v1199_v43 = vperm.slane %v1195_v34, 0 }
0x115c   :  { %v1134_v45 = vunpack.c.l.b16 %v1020_v12 }
0x1160   :  { %1183 = vmatpush.bf16.xpose.msrb.mxu3 %v1173_v5 }
0x1161   :  { %v972_v41 = vpop.f32.mrf.mxu2 }
0x1162   :  { %1105 = vmatpush.bf16.xpose.msrb.mxu2 %v1087_v25  ;;  %v1021_v14 = vpack.c.bf16 %v972_v41, %v972_v41 }
0x1164   :  { %v1135_v18 = vunpack.c.l.b16 %v1021_v14 }
0x1166   :  { %v1148_v22 = vpack.c.b16 %v1135_v18, %v1134_v45 }
0x1168   :  { %1184 = vmatpush.bf16.xpose.msrb.mxu3 %v1170_v6  ;;  %v1164_v27 = vsel %vm155_vm7, %v1148_v22, 0 }
0x116a   :  { %1106 = vmatpush.bf16.xpose.msrb.mxu2 %v1084_v47 }
0x1170   :  { %1185 = vmatpush.bf16.xpose.msrb.mxu3 %v1167_v60 }
0x1172   :  { %1107 = vmatpush.bf16.xpose.msrb.mxu2 %v1081_v23 }
0x1178   :  { %1186 = vmatpush.bf16.xpose.msrb.mxu3 %v1164_v27 }
0x117a   :  { %1108 = vmatpush.bf16.xpose.msrb.mxu2 %v1078_v58 }
0x1180   :  { %1187 = vmatpush.bf16.xpose.msrb.mxu3 %v1161_v35 }
0x11ab   :  { %v675_v0 = vpop.permute.xlu0 %674 }
0x11ac   :  { %v677_v1 = vmul.f32 %v675_v0, %v672_v63 }
0x11ae   :  { %v679_v2 = vadd.f32 %v678_v62, %v677_v1 }
0x11b0   :  { %681 = vrot.lane.b32.xlu1 %v679_v2, %s1663_s21 }
0x11b3   :  { %v548_v42 = vpop.permute.xlu0 %547 }
0x11b4   :  { %551 = vst.msk [vmem:[#allocation3 + $0xa] sm:$0x3] %vm215_vm8, %v548_v42  ;;  %v1196_v42 = vlaneseq }
0x11b6   :  { %v1197_v9 = vand.u32 127, %v1196_v42 }
0x11b8   :  { %480 = vrot.lane.b32.xlu1 %v1823_v10, %s1663_s21  ;;  %v1017_v10 = vpack.c.bf16 %v962_v3, %v962_v3 }
0x11ba   :  { %v1131_v32 = vunpack.c.l.b16 %v1017_v10 }
0x11bb   :  { %v347_v33 = vpop.permute.xlu0 %346  ;;  %v692_v8 = vld [vmem:[#allocation3 + $0xa] sm:$0x3] }
0x11bc   :  { %350 = vst.msk [vmem:[#allocation3 + $0x4] sm:$0x3] %vm215_vm8, %v347_v33  ;;  %v1146_v37 = vpack.c.b16 %v1131_v32, %v1130_v31 }
0x11be   :  { %v1158_v39 = vsel %vm155_vm7, %v1146_v37, 0 }
0x11bf   :  { %1188 = vmatpush.bf16.xpose.msrb.mxu3 %v1158_v39 }
0x11c0   :  { %1204 = vperm.xlu1 %1524, %v1199_v43  }
0x11c3   :  { %v689_v25 = vld [vmem:[#allocation3 + $0x4] sm:$0x3] }
0x11c4   :  { %v695_v47 = vrot.slane %v689_v25, 4 }
0x11c6   :  { %v696_v51 = vsel %vm73_vm1, %v695_v47, %v687_v50 }
0x11c7   :  { %v700_v23 = vperm.slane %v696_v51, %v1740_v11  ;;  %v1202_v33 = vpop.permute.xlu0 %1201 }
0x11c8   :  { %vm1206_vm10 = vcmp.lt.s32.totalorder %v1197_v9, %v1202_v33 }
0x11c9   :  { %v720_v56 = vsel %vm73_vm1, %v719_v16, %v700_v23 }
0x11ca   :  { %v724_v4 = vperm.slane %v720_v56, %v1745_v19 }
0x11cc   :  { %v733_v63 = vrot.slane %v724_v4, 4 }
0x1222   :  { %v682_v44 = vpop.permute.xlu1 %681 }
0x1223   :  { %685 = vst.msk [vmem:[#allocation3 + $0xe] sm:$0x3] %vm215_vm8, %v682_v44 }
0x1224   :  { %686 = vst.msk [vmem:[#allocation8] sm:$0x3] %vm215_vm8, %v682_v44 }
0x122a   :  { %v481_v52 = vpop.permute.xlu1 %480  ;;  %v694_v30 = vld [vmem:[#allocation3 + $0xe] sm:$0x3] }
0x122b   :  { %484 = vst.msk [vmem:[#allocation3 + $0x8] sm:$0x3] %vm215_vm8, %v481_v52  ;;  %v713_v55 = vrot.slane %v694_v30, 4 }
0x122d   :  { %v714_v24 = vsel %vm73_vm1, %v713_v55, %v692_v8 }
0x122e   :  { %v718_v17 = vperm.slane %v714_v24, %v1740_v11 }
0x1230   :  { %v725_v6 = vrot.slane %v718_v17, 4 }
0x1232   :  { %v691_v58 = vld [vmem:[#allocation3 + $0x8] sm:$0x3] }
0x1233   :  { %v708_v59 = vsel %vm73_vm1, %v707_v57, %v691_v58 }
0x1234   :  { %v712_v5 = vperm.slane %v708_v59, %v1740_v11  ;;  %v1205_v11 = vpop.permute.xlu1 %1204 }
0x1235   :  { %vm1207_vm9 = vcmp.lt.s32.totalorder %v1197_v9, %v1205_v11 }
0x1236   :  { %v726_v60 = vsel %vm73_vm1, %v725_v6, %v712_v5 }
0x1237   :  { %v730_v61 = vperm.slane %v726_v60, %v1745_v19 }
0x1239   :  { %v734_v0 = vsel %vm73_vm1, %v730_v61, %v733_v63  ;;  %v731_v62 = vrot.slane %v730_v61, 4 }
0x123a   :  { %v1033_v1 = vpack.c.bf16 %v734_v0, %v734_v0 }
0x123b   :  { %v732_v2 = vsel %vm73_vm1, %v731_v62, %v724_v4 }
0x123c   :  { %1485 = vmatmul.msk.bf16.vlgmr.msrb.gmra.mxu3 %vm155_vm7, %v1033_v1  ;;  %v1032_v3 = vpack.c.bf16 %v732_v2, %v732_v2 }
0x123e   :  { %1484 = vmatmul.msk.bf16.vlgmr.msrb.gmra.mxu2 %vm155_vm7, %v1032_v3 }
0x12bf   :  { %v1190_v36 = vpop.f32.mrf.mxu3 }
0x12c0   :  { %v1209_v19 = vsel %vm1207_vm9, %v1190_v36, -1e+30 }
0x12c1   :  { %1212 = vmax.xlane.f32.xlu1 %v1209_v19  ;;  %v1110_v38 = vpop.f32.mrf.mxu2 }
0x12c2   :  { %v1208_v12 = vsel %vm1206_vm10, %v1110_v38, -1e+30 }
0x12c3   :  { %1210 = vmax.xlane.f32.xlu2 %v1208_v12 }
0x12c7   :  { %v1192_v41 = vpop.f32.mrf.mxu3 }
0x12c9   :  { %v1112_v15 = vpop.f32.mrf.mxu2 }
0x12da   :  { %1306 = vrot.lane.b32.xlu1 %v734_v0, %s1664_s0 }
0x1334   :  { %v1213_v54 = vpop.xlane.xlu1 %1212 }
0x1335   :  { %v1215_v45 = vsub.f32 %v1209_v19, %v1213_v54 }
0x1336   :  { %v1211_v14 = vpop.xlane.xlu2 %1210 }
0x1337   :  { %v1218_v18 = vmul.f32 1.442695, %v1215_v45  ;;  %v1214_v20 = vsub.f32 %v1208_v12, %v1211_v14 }
0x1339   :  { %1575 = vpow2.f32 %v1218_v18  ;;  %v1216_v21 = vmul.f32 1.442695, %v1214_v20 }
0x133b   :  { %1577 = vpow2.f32 %v1216_v21 }
0x133f   :  { %v1576_v22 = vpop.eup %1575 }
0x1340   :  { %1222 = vadd.xlane.f32.xlu2 %v1576_v22 }
0x1341   :  { %v1578_v27 = vpop.eup %1577 }
0x1342   :  { %1220 = vadd.xlane.f32.xlu0 %v1578_v27 }
0x134c   :  { %v1307_v17 = vpop.permute.xlu1 %1306 }
0x1358   :  { %1304 = vrot.lane.b32.xlu2 %v732_v2, %s1664_s0 }
0x13b3   :  { %v1223_v26 = vpop.xlane.xlu2 %1222 }
0x13b4   :  { %1579 = vrcp.f32 %v1223_v26  ;;  %v1249_v39 = vand.u32 2147483648, %v1223_v26  ;;  %v1247_v34 = vand.u32 2147483647, %v1223_v26  ;;  %vm1243_vm11 = vweird.f32 %v1223_v26 }
0x13b5   :  { %v1221_v10 = vpop.xlane.xlu0 %1220 }
0x13b6   :  { %1581 = vrcp.f32 %v1221_v10  ;;  %v1235_v43 = vand.u32 2147483648, %v1221_v10  ;;  %v1233_v46 = vand.u32 2147483647, %v1221_v10  ;;  %v1250_v28 = vor.u32 1.1754944e-38, %v1249_v39 }
0x13b7   :  { %vm1248_vm14 = vcmp.eq.f32.partialorder %v1247_v34, 8.507059e+37  ;;  %vm1229_vm15 = vweird.f32 %v1221_v10 }
0x13b8   :  { %v1236_v49 = vor.u32 1.1754944e-38, %v1235_v43  ;;  %vm1234_vm2 = vcmp.eq.f32.partialorder %v1233_v46, 8.507059e+37 }
0x13ba   :  { %v1580_v29 = vpop.eup %1579 }
0x13bb   :  { %v1239_v31 = vmul.f32 %v1580_v29, %v1223_v26  ;;  %vm1244_vm1 = vweird.f32 %v1580_v29  ;;  %v1305_v24 = vpop.permute.xlu2 %1304 }
0x13bc   :  { %v1582_v32 = vpop.eup %1581  ;;  %vm1245_vm13 = vmor %vm1243_vm11, %vm1244_vm1 }
0x13bd   :  { %v1240_v35 = vsub.f32 1.0, %v1239_v31  ;;  %v1225_v37 = vmul.f32 %v1582_v32, %v1221_v10  ;;  %vm1230_vm12 = vweird.f32 %v1582_v32 }
0x13be   :  { %vm1231_vm0 = vmor %vm1229_vm15, %vm1230_vm12 }
0x13bf   :  { %v1241_v7 = vmul.f32 %v1580_v29, %v1240_v35  ;;  %v1226_v40 = vsub.f32 1.0, %v1225_v37 }
0x13c1   :  { %v1242_v44 = vadd.f32 %v1580_v29, %v1241_v7  ;;  %v1227_v25 = vmul.f32 %v1582_v32, %v1226_v40 }
0x13c3   :  { %v1246_v47 = vsel %vm1245_vm13, %v1580_v29, %v1242_v44  ;;  %v1228_v48 = vadd.f32 %v1582_v32, %v1227_v25 }
0x13c4   :  { %v1251_v50 = vsel %vm1248_vm14, %v1250_v28, %v1246_v47 }
0x13c5   :  { %v1232_v51 = vsel %vm1231_vm0, %v1582_v32, %v1228_v48  ;;  %v1253_v52 = vmul.f32 %v1576_v22, %v1251_v50 }
0x13c6   :  { %v1237_v30 = vsel %vm1234_vm2, %v1236_v49, %v1232_v51 }
0x13c7   :  { %v1252_v53 = vmul.f32 %v1578_v27, %v1237_v30  ;;  %1299 = vst [vmem:[#allocation6 + $0x8] sm:$0xff] %v1253_v52  ;;  %v1255_v8 = vpack.c.bf16 %v1253_v52, %v1253_v52 }
0x13c9   :  { %v1254_v55 = vpack.c.bf16 %v1252_v53, %v1252_v53  ;;  %1298 = vst [vmem:[#allocation6] sm:$0xff] %v1252_v53 }
0x13ca   :  { %1338 = dma.vmem_to_hbm [thread:$0]  %s1331_s16, 256, %s1333_s14, [#allocation7], %s1666_s17, %s1666_s17, %s1667_s18  }
0x13cb   :  { %1272 = vmatmul.bf16.vlgmr.msra.gmra.mxu0 %v1254_v55  ;;  %1349 = dma.vmem_to_hbm [thread:$0]  %s1345_s20, 32, %s1347_s4, [#allocation7]  }
0x13db   :  { %1293 = vmatmul.bf16.vlgmr.msrb.gmra.mxu0 %v1255_v8 }
0x1448   :  { %v1273_v23 = vpop.f32.mrf.mxu0 }
0x1449   :  { %1300 = vst.msk [vmem:[#allocation4] sm:$0xff] %vm155_vm7, %v1273_v23 }
0x144a   :  { %1311 = vst.msk [vmem:[#allocation4] sm:$0xff] %vm1310_vm3, %v1305_v24 }
0x1450   :  { %v1275_v13 = vpop.f32.mrf.mxu0 }
0x1458   :  { %v1294_v16 = vpop.f32.mrf.mxu0 }
0x1459   :  { %1301 = vst.msk [vmem:[#allocation4 + $0x8] sm:$0xff] %vm155_vm7, %v1294_v16 }
0x145a   :  { %1312 = vst.msk [vmem:[#allocation4 + $0x8] sm:$0xff] %vm1310_vm3, %v1307_v17 }
0x145b   :  { %1325 = dma.vmem_to_hbm [thread:$0]  %s1318_s5, 256, %s1320_s24, [#allocation5], %s1666_s17, %s1666_s17, %s1667_s18  }
0x1460   :  { %v1296_v56 = vpop.f32.mrf.mxu0 }
0x1461   :  { %1655 = dma.done.wait [#allocation5], 256  }
0x1462   :  { %1656 = vsyncadd [#allocation5], 4294967040 }
0x1463   :  { %1657 = dma.done.wait [#allocation7], 288  }
0x1464   :  { %1658 = vsyncadd [#allocation7], 4294967008 }
0x1465   :  { %1362 = vsyncpa [#allocation5], 1 }
0x1466   :  { %1363 = vsyncpa [#allocation7], 1 }

</bundles_post_ra>
